<compile_context>
chip_gen: v6e
topology: v6e:2x2x1
jax: 0.10.0
libtpu: 0.0.40
codegen_flags: <defaults>
</compile_context>

<pallas_src>
import jax
import jax.numpy as jnp
from jax.experimental import pallas as pl
from jax.experimental.pallas import tpu as pltpu

# ---------------------------------------------------------------------------
# Config (small, shape-consistent with the reference forward pass)
# ---------------------------------------------------------------------------
HID_DS = [4, 4, 4, 4]            # 3 upsample layers, 3 downsample layers
SIZES = [[16, 16]] * 4
STRIDE = 1
BATCH = 2
BN_EPS = 1e-5
N_UP = len(HID_DS) - 1
N_DOWN = len(HID_DS) - 1
N_LAYERS = N_UP + N_DOWN
C_CH = HID_DS[0]

# TODO(synk): Dropout2d(0.3) and BatchNorm2d are evaluated in inference mode
# (dropout = identity, BN uses running statistics); train-mode random channel
# dropout / batch statistics have no deterministic Pallas equivalent here.


# ---------------------------------------------------------------------------
# Single fused Pallas kernel: the whole Unet forward, activations resident
# ---------------------------------------------------------------------------
def _unet_fused_kernel(w_ref, bs_ref, x_ref, o_ref):
    """Whole 6-layer forward on one (N*C, M) activation block.

    w_ref  : SMEM f32[N_LAYERS*C*C]  BN-folded 1x1 conv weights (scalars)
    bs_ref : SMEM f32[N_LAYERS*C*2]  interleaved (folded bias, BN shift)
    x_ref  : VMEM f32[N*C, M]        lanes = spatial, M multiple of 128
    o_ref  : VMEM f32[N*C, M]
    """
    C = C_CH
    x = x_ref[...]
    nb = x.shape[0] // C

    def w(l, o, i):
        return w_ref[l * C * C + o * C + i]

    def bias(l, o):
        return bs_ref[l * C * 2 + o * 2]

    def shift(l, o):
        return bs_ref[l * C * 2 + o * 2 + 1]

    def layer(l, rows):
        # relu(W_folded x + b_folded) + bn_shift per (batch, out-channel) row.
        # Scalar (SMEM) * row FMAs: scalar operands broadcast for free on the
        # VPU -> no per-FMA lane-slice or sublane-broadcast work.
        out = []
        for n in range(nb):
            base = n * C
            for o in range(C):
                acc = w(l, o, 0) * rows[base]
                for i in range(1, C):
                    acc = acc + w(l, o, i) * rows[base + i]
                out.append(jnp.maximum(acc + bias(l, o), 0.0) + shift(l, o))
        return out

    # Split once into per-(batch, channel) lane-dense rows of shape (1, M).
    rows = [x[r:r + 1, :] for r in range(nb * C)]

    # ---- upsample chain: ConvTranspose(1x1) + ReLU + BN(eval) --------------
    skips = []
    for l in range(N_UP):                      # static, unrolled
        rows = layer(l, rows)
        skips.append(rows)                     # img_zs never leave vregs/VMEM

    # ---- downsample chain: Conv(1x1) + ReLU + BN(eval) + reversed skip -----
    skips.reverse()
    for l in range(N_DOWN):
        mixed = layer(N_UP + l, rows)
        rows = [m + s for m, s in zip(mixed, skips[l])]

    # One dense (N*C, M) store: unmasked, fully lane-dense vst.
    o_ref[...] = jnp.concatenate(rows, axis=0).astype(o_ref.dtype)


def unet_pallas(x2, w_flat, bs_flat):
    """Run the fused 6-layer forward on a (N*C, M) activation."""
    NC, M = x2.shape
    assert NC % C_CH == 0
    # Keep the output store lane-dense (unmasked vst) for any future config.
    pad = (-M) % 128
    Mp = M + pad
    if pad:
        x2 = jnp.pad(x2, ((0, 0), (0, pad)))

    flops = N_LAYERS * NC * (2 * C_CH + 3) * Mp + N_DOWN * NC * Mp
    bytes_accessed = (2 * NC * Mp + int(w_flat.size) + int(bs_flat.size)) * 4

    y = pl.pallas_call(
        _unet_fused_kernel,
        out_shape=jax.ShapeDtypeStruct((NC, Mp), jnp.float32),
        in_specs=[
            pl.BlockSpec(memory_space=pltpu.MemorySpace.SMEM),   # weights
            pl.BlockSpec(memory_space=pltpu.MemorySpace.SMEM),   # bias/shift
            pl.BlockSpec(memory_space=pltpu.MemorySpace.VMEM),   # activation
        ],
        out_specs=pl.BlockSpec(memory_space=pltpu.MemorySpace.VMEM),
        cost_estimate=pl.CostEstimate(
            flops=flops, transcendentals=0, bytes_accessed=bytes_accessed),
    )(w_flat, bs_flat, x2)
    return y[:, :M] if pad else y


# ---------------------------------------------------------------------------
# Layout glue: metadata-only reshapes (no transposes, no extra device kernels)
# ---------------------------------------------------------------------------
def unet_forward(x_nchw, fused):
    N, C, H, W = x_nchw.shape
    x2 = x_nchw.reshape(N * C, H * W)            # contiguous reshape: free
    y2 = unet_pallas(x2, fused["w_flat"], fused["bs_flat"])
    return y2.reshape(N, C, H, W)                # free


# ---------------------------------------------------------------------------
# Parameter construction (deterministic, mirrors Unet.__init__)
# ---------------------------------------------------------------------------
def _conv_params(key, cin, cout, k, stride, transpose):
    k1, k2, k3, k4, k5, k6 = jax.random.split(key, 6)
    wshape = (cin, cout, k, k) if transpose else (cout, cin, k, k)
    return {
        "w": 0.2 * jax.random.normal(k1, wshape, jnp.float32),
        "b": 0.1 * jax.random.normal(k2, (cout,), jnp.float32),
        "gamma": jax.random.uniform(k3, (cout,), jnp.float32, 0.5, 1.5),
        "beta": 0.1 * jax.random.normal(k4, (cout,), jnp.float32),
        "mean": 0.1 * jax.random.normal(k5, (cout,), jnp.float32),
        "var": jax.random.uniform(k6, (cout,), jnp.float32, 0.5, 1.5),
        "k": k,
        "stride": stride,
    }


def init_unet_params(key, hid_ds, sizes, stride):
    assert all(d == hid_ds[0] for d in hid_ds) and all(s == sizes[0] for s in sizes), \
        "Unet.forward skip-adds require identical hid_ds / sizes"
    hid_ds = list(hid_ds)
    sizes = [list(s) for s in sizes]
    params = {"down": [], "up": []}
    keys = jax.random.split(key, 2 * (len(hid_ds) - 1))
    ki = 0
    # downsample layers (built before the reversal, as in the reference)
    for i in range(len(hid_ds) - 1):
        kh = -int((sizes[i + 1][0] - 1) * stride - sizes[i][0])
        kw = -int((sizes[i + 1][1] - 1) * stride - sizes[i][1])
        assert kh == kw == 1 and stride == 1, "fused path assumes 1x1/stride-1 convs"
        params["down"].append(
            _conv_params(keys[ki], hid_ds[i], hid_ds[i + 1], kh, stride, False))
        ki += 1
    sizes.reverse()
    hid_ds.reverse()
    # upsample layers (built after reversal, as in the reference)
    for i in range(len(hid_ds) - 1):
        kh = -int((sizes[i][0] - 1) * stride - sizes[i + 1][0])
        kw = -int((sizes[i][1] - 1) * stride - sizes[i + 1][1])
        assert kh == kw == 1 and stride == 1, "fused path assumes 1x1/stride-1 convs"
        params["up"].append(
            _conv_params(keys[ki], hid_ds[i], hid_ds[i + 1], kh, stride, True))
        ki += 1
    return params


def fold_params(params):
    """Fold BN (eval) scale into conv weight/bias; pack flat SMEM tables.

    Precondition (documented): relu(z)*s == relu(z*s) requires the BN scale
    s = gamma/sqrt(var+eps) to be > 0, which this init guarantees.  The check
    below is skipped under tracing to stay jit-safe.
    """
    def fold_one(p, transpose):
        assert p["k"] == 1 and p["stride"] == 1
        scale = p["gamma"] / jnp.sqrt(p["var"] + BN_EPS)
        if not isinstance(scale, jax.core.Tracer):
            assert bool(jnp.all(scale > 0)), "BN-scale folding requires gamma > 0"
        shift = p["beta"] - p["mean"] * scale
        w2 = p["w"][:, :, 0, 0]
        w_eff = w2.T if transpose else w2          # (Cout, Cin)
        w_f = w_eff * scale[:, None]               # (Cout, Cin)
        b_f = p["b"] * scale                       # (Cout,)
        return w_f, b_f, shift

    layers = ([fold_one(p, True) for p in params["up"]] +
              [fold_one(p, False) for p in params["down"]])
    # Flat 1-D tables (avoid SMEM 2-D (8,128) padding):
    #   w_flat[l*C*C + o*C + i], bs_flat[l*C*2 + o*2 + {0:bias, 1:shift}]
    w_flat = jnp.concatenate([w.reshape(-1) for (w, _, _) in layers])
    bs_flat = jnp.concatenate(
        [jnp.stack([b, s], axis=1).reshape(-1) for (_, b, s) in layers])
    return {"w_flat": w_flat, "bs_flat": bs_flat}


# ---------------------------------------------------------------------------
# Plain-JAX eval-mode reference (for a numerical sanity check)
# ---------------------------------------------------------------------------
def _layer_reference(x, p, transpose):
    w2 = p["w"][:, :, 0, 0]
    eq = "io,nihw->nohw" if transpose else "oi,nihw->nohw"
    z = jnp.einsum(eq, w2, x, precision=jax.lax.Precision.HIGHEST)
    z = z + p["b"][None, :, None, None]
    r = jnp.maximum(z, 0.0)
    scale = p["gamma"] / jnp.sqrt(p["var"] + BN_EPS)
    shift = p["beta"] - p["mean"] * scale
    return r * scale[None, :, None, None] + shift[None, :, None, None]


def unet_reference(x, params):
    zs = []
    for p in params["up"]:
        x = _layer_reference(x, p, True)
        zs.append(x)
    zs = zs[::-1]
    for i, p in enumerate(params["down"]):
        x = _layer_reference(x, p, False) + zs[i]
    return x


# ---------------------------------------------------------------------------
if __name__ == "__main__":
    key = jax.random.PRNGKey(0)
    kx, kp = jax.random.split(key)
    params = init_unet_params(kp, HID_DS, SIZES, STRIDE)
    fused = fold_params(params)

    # Unet.forward applies the upsample chain first, so the input uses the
    # reversed hid_ds[0] channels and reversed sizes[0] spatial extent.
    x = jax.random.normal(
        kx, (BATCH, HID_DS[-1], SIZES[-1][0], SIZES[-1][1]), jnp.float32)

    fwd = jax.jit(unet_forward)
    y = fwd(x, fused)
    jax.block_until_ready(y)

    assert y.shape == (BATCH, HID_DS[0], SIZES[0][0], SIZES[0][1]), y.shape
    assert bool(jnp.all(jnp.isfinite(y)))

    y_ref = unet_reference(x, params)
    max_err = float(jnp.max(jnp.abs(y - y_ref)))
    assert max_err < 1e-3, f"max abs err vs reference: {max_err}"

    print("KERNEL_OK")
</pallas_src>

<mosaic_0001>
module attributes {stable_mosaic.version = 11 : i64} {
  func.func @_unet_fused_kernel(%arg0: memref<96xf32, #tpu.memory_space<smem>>, %arg1: memref<48xf32, #tpu.memory_space<smem>>, %arg2: memref<8x256xf32, #tpu.memory_space<vmem>>, %arg3: memref<8x256xf32, #tpu.memory_space<vmem>>) attributes {dimension_semantics = [], scalar_prefetch = 0 : i64, scratch_operands = 0 : i64, tpu.core_type = #tpu.core_type<tc>} {
    %c0 = arith.constant 0 : index
    %c0_0 = arith.constant 0 : index
    %0 = vector.load %arg2[%c0, %c0_0] : memref<8x256xf32, #tpu.memory_space<vmem>>, vector<8x256xf32>
    %1 = vector.extract_strided_slice %0 {offsets = [0, 0], sizes = [1, 256], strides = [1, 1]} : vector<8x256xf32> to vector<1x256xf32>
    %2 = vector.extract_strided_slice %0 {offsets = [1, 0], sizes = [1, 256], strides = [1, 1]} : vector<8x256xf32> to vector<1x256xf32>
    %3 = vector.extract_strided_slice %0 {offsets = [2, 0], sizes = [1, 256], strides = [1, 1]} : vector<8x256xf32> to vector<1x256xf32>
    %4 = vector.extract_strided_slice %0 {offsets = [3, 0], sizes = [1, 256], strides = [1, 1]} : vector<8x256xf32> to vector<1x256xf32>
    %5 = vector.extract_strided_slice %0 {offsets = [4, 0], sizes = [1, 256], strides = [1, 1]} : vector<8x256xf32> to vector<1x256xf32>
    %6 = vector.extract_strided_slice %0 {offsets = [5, 0], sizes = [1, 256], strides = [1, 1]} : vector<8x256xf32> to vector<1x256xf32>
    %7 = vector.extract_strided_slice %0 {offsets = [6, 0], sizes = [1, 256], strides = [1, 1]} : vector<8x256xf32> to vector<1x256xf32>
    %8 = vector.extract_strided_slice %0 {offsets = [7, 0], sizes = [1, 256], strides = [1, 1]} : vector<8x256xf32> to vector<1x256xf32>
    %c0_1 = arith.constant 0 : index
    %9 = memref.load %arg0[%c0_1] : memref<96xf32, #tpu.memory_space<smem>>
    %10 = vector.broadcast %9 : f32 to vector<1x256xf32>
    %11 = arith.mulf %10, %1 : vector<1x256xf32>
    %c1 = arith.constant 1 : index
    %12 = memref.load %arg0[%c1] : memref<96xf32, #tpu.memory_space<smem>>
    %13 = vector.broadcast %12 : f32 to vector<1x256xf32>
    %14 = arith.mulf %13, %2 : vector<1x256xf32>
    %15 = arith.addf %11, %14 : vector<1x256xf32>
    %c2 = arith.constant 2 : index
    %16 = memref.load %arg0[%c2] : memref<96xf32, #tpu.memory_space<smem>>
    %17 = vector.broadcast %16 : f32 to vector<1x256xf32>
    %18 = arith.mulf %17, %3 : vector<1x256xf32>
    %19 = arith.addf %15, %18 : vector<1x256xf32>
    %c3 = arith.constant 3 : index
    %20 = memref.load %arg0[%c3] : memref<96xf32, #tpu.memory_space<smem>>
    %21 = vector.broadcast %20 : f32 to vector<1x256xf32>
    %22 = arith.mulf %21, %4 : vector<1x256xf32>
    %23 = arith.addf %19, %22 : vector<1x256xf32>
    %c0_2 = arith.constant 0 : index
    %24 = memref.load %arg1[%c0_2] : memref<48xf32, #tpu.memory_space<smem>>
    %25 = vector.broadcast %24 : f32 to vector<1x256xf32>
    %26 = arith.addf %23, %25 : vector<1x256xf32>
    %cst = arith.constant 0.000000e+00 : f32
    %27 = vector.broadcast %cst : f32 to vector<1x256xf32>
    %28 = arith.maximumf %26, %27 : vector<1x256xf32>
    %c1_3 = arith.constant 1 : index
    %29 = memref.load %arg1[%c1_3] : memref<48xf32, #tpu.memory_space<smem>>
    %30 = vector.broadcast %29 : f32 to vector<1x256xf32>
    %31 = arith.addf %28, %30 : vector<1x256xf32>
    %c4 = arith.constant 4 : index
    %32 = memref.load %arg0[%c4] : memref<96xf32, #tpu.memory_space<smem>>
    %33 = vector.broadcast %32 : f32 to vector<1x256xf32>
    %34 = arith.mulf %33, %1 : vector<1x256xf32>
    %c5 = arith.constant 5 : index
    %35 = memref.load %arg0[%c5] : memref<96xf32, #tpu.memory_space<smem>>
    %36 = vector.broadcast %35 : f32 to vector<1x256xf32>
    %37 = arith.mulf %36, %2 : vector<1x256xf32>
    %38 = arith.addf %34, %37 : vector<1x256xf32>
    %c6 = arith.constant 6 : index
    %39 = memref.load %arg0[%c6] : memref<96xf32, #tpu.memory_space<smem>>
    %40 = vector.broadcast %39 : f32 to vector<1x256xf32>
    %41 = arith.mulf %40, %3 : vector<1x256xf32>
    %42 = arith.addf %38, %41 : vector<1x256xf32>
    %c7 = arith.constant 7 : index
    %43 = memref.load %arg0[%c7] : memref<96xf32, #tpu.memory_space<smem>>
    %44 = vector.broadcast %43 : f32 to vector<1x256xf32>
    %45 = arith.mulf %44, %4 : vector<1x256xf32>
    %46 = arith.addf %42, %45 : vector<1x256xf32>
    %c2_4 = arith.constant 2 : index
    %47 = memref.load %arg1[%c2_4] : memref<48xf32, #tpu.memory_space<smem>>
    %48 = vector.broadcast %47 : f32 to vector<1x256xf32>
    %49 = arith.addf %46, %48 : vector<1x256xf32>
    %cst_5 = arith.constant 0.000000e+00 : f32
    %50 = vector.broadcast %cst_5 : f32 to vector<1x256xf32>
    %51 = arith.maximumf %49, %50 : vector<1x256xf32>
    %c3_6 = arith.constant 3 : index
    %52 = memref.load %arg1[%c3_6] : memref<48xf32, #tpu.memory_space<smem>>
    %53 = vector.broadcast %52 : f32 to vector<1x256xf32>
    %54 = arith.addf %51, %53 : vector<1x256xf32>
    %c8 = arith.constant 8 : index
    %55 = memref.load %arg0[%c8] : memref<96xf32, #tpu.memory_space<smem>>
    %56 = vector.broadcast %55 : f32 to vector<1x256xf32>
    %57 = arith.mulf %56, %1 : vector<1x256xf32>
    %c9 = arith.constant 9 : index
    %58 = memref.load %arg0[%c9] : memref<96xf32, #tpu.memory_space<smem>>
    %59 = vector.broadcast %58 : f32 to vector<1x256xf32>
    %60 = arith.mulf %59, %2 : vector<1x256xf32>
    %61 = arith.addf %57, %60 : vector<1x256xf32>
    %c10 = arith.constant 10 : index
    %62 = memref.load %arg0[%c10] : memref<96xf32, #tpu.memory_space<smem>>
    %63 = vector.broadcast %62 : f32 to vector<1x256xf32>
    %64 = arith.mulf %63, %3 : vector<1x256xf32>
    %65 = arith.addf %61, %64 : vector<1x256xf32>
    %c11 = arith.constant 11 : index
    %66 = memref.load %arg0[%c11] : memref<96xf32, #tpu.memory_space<smem>>
    %67 = vector.broadcast %66 : f32 to vector<1x256xf32>
    %68 = arith.mulf %67, %4 : vector<1x256xf32>
    %69 = arith.addf %65, %68 : vector<1x256xf32>
    %c4_7 = arith.constant 4 : index
    %70 = memref.load %arg1[%c4_7] : memref<48xf32, #tpu.memory_space<smem>>
    %71 = vector.broadcast %70 : f32 to vector<1x256xf32>
    %72 = arith.addf %69, %71 : vector<1x256xf32>
    %cst_8 = arith.constant 0.000000e+00 : f32
    %73 = vector.broadcast %cst_8 : f32 to vector<1x256xf32>
    %74 = arith.maximumf %72, %73 : vector<1x256xf32>
    %c5_9 = arith.constant 5 : index
    %75 = memref.load %arg1[%c5_9] : memref<48xf32, #tpu.memory_space<smem>>
    %76 = vector.broadcast %75 : f32 to vector<1x256xf32>
    %77 = arith.addf %74, %76 : vector<1x256xf32>
    %c12 = arith.constant 12 : index
    %78 = memref.load %arg0[%c12] : memref<96xf32, #tpu.memory_space<smem>>
    %79 = vector.broadcast %78 : f32 to vector<1x256xf32>
    %80 = arith.mulf %79, %1 : vector<1x256xf32>
    %c13 = arith.constant 13 : index
    %81 = memref.load %arg0[%c13] : memref<96xf32, #tpu.memory_space<smem>>
    %82 = vector.broadcast %81 : f32 to vector<1x256xf32>
    %83 = arith.mulf %82, %2 : vector<1x256xf32>
    %84 = arith.addf %80, %83 : vector<1x256xf32>
    %c14 = arith.constant 14 : index
    %85 = memref.load %arg0[%c14] : memref<96xf32, #tpu.memory_space<smem>>
    %86 = vector.broadcast %85 : f32 to vector<1x256xf32>
    %87 = arith.mulf %86, %3 : vector<1x256xf32>
    %88 = arith.addf %84, %87 : vector<1x256xf32>
    %c15 = arith.constant 15 : index
    %89 = memref.load %arg0[%c15] : memref<96xf32, #tpu.memory_space<smem>>
    %90 = vector.broadcast %89 : f32 to vector<1x256xf32>
    %91 = arith.mulf %90, %4 : vector<1x256xf32>
    %92 = arith.addf %88, %91 : vector<1x256xf32>
    %c6_10 = arith.constant 6 : index
    %93 = memref.load %arg1[%c6_10] : memref<48xf32, #tpu.memory_space<smem>>
    %94 = vector.broadcast %93 : f32 to vector<1x256xf32>
    %95 = arith.addf %92, %94 : vector<1x256xf32>
    %cst_11 = arith.constant 0.000000e+00 : f32
    %96 = vector.broadcast %cst_11 : f32 to vector<1x256xf32>
    %97 = arith.maximumf %95, %96 : vector<1x256xf32>
    %c7_12 = arith.constant 7 : index
    %98 = memref.load %arg1[%c7_12] : memref<48xf32, #tpu.memory_space<smem>>
    %99 = vector.broadcast %98 : f32 to vector<1x256xf32>
    %100 = arith.addf %97, %99 : vector<1x256xf32>
    %c0_13 = arith.constant 0 : index
    %101 = memref.load %arg0[%c0_13] : memref<96xf32, #tpu.memory_space<smem>>
    %102 = vector.broadcast %101 : f32 to vector<1x256xf32>
    %103 = arith.mulf %102, %5 : vector<1x256xf32>
    %c1_14 = arith.constant 1 : index
    %104 = memref.load %arg0[%c1_14] : memref<96xf32, #tpu.memory_space<smem>>
    %105 = vector.broadcast %104 : f32 to vector<1x256xf32>
    %106 = arith.mulf %105, %6 : vector<1x256xf32>
    %107 = arith.addf %103, %106 : vector<1x256xf32>
    %c2_15 = arith.constant 2 : index
    %108 = memref.load %arg0[%c2_15] : memref<96xf32, #tpu.memory_space<smem>>
    %109 = vector.broadcast %108 : f32 to vector<1x256xf32>
    %110 = arith.mulf %109, %7 : vector<1x256xf32>
    %111 = arith.addf %107, %110 : vector<1x256xf32>
    %c3_16 = arith.constant 3 : index
    %112 = memref.load %arg0[%c3_16] : memref<96xf32, #tpu.memory_space<smem>>
    %113 = vector.broadcast %112 : f32 to vector<1x256xf32>
    %114 = arith.mulf %113, %8 : vector<1x256xf32>
    %115 = arith.addf %111, %114 : vector<1x256xf32>
    %c0_17 = arith.constant 0 : index
    %116 = memref.load %arg1[%c0_17] : memref<48xf32, #tpu.memory_space<smem>>
    %117 = vector.broadcast %116 : f32 to vector<1x256xf32>
    %118 = arith.addf %115, %117 : vector<1x256xf32>
    %cst_18 = arith.constant 0.000000e+00 : f32
    %119 = vector.broadcast %cst_18 : f32 to vector<1x256xf32>
    %120 = arith.maximumf %118, %119 : vector<1x256xf32>
    %c1_19 = arith.constant 1 : index
    %121 = memref.load %arg1[%c1_19] : memref<48xf32, #tpu.memory_space<smem>>
    %122 = vector.broadcast %121 : f32 to vector<1x256xf32>
    %123 = arith.addf %120, %122 : vector<1x256xf32>
    %c4_20 = arith.constant 4 : index
    %124 = memref.load %arg0[%c4_20] : memref<96xf32, #tpu.memory_space<smem>>
    %125 = vector.broadcast %124 : f32 to vector<1x256xf32>
    %126 = arith.mulf %125, %5 : vector<1x256xf32>
    %c5_21 = arith.constant 5 : index
    %127 = memref.load %arg0[%c5_21] : memref<96xf32, #tpu.memory_space<smem>>
    %128 = vector.broadcast %127 : f32 to vector<1x256xf32>
    %129 = arith.mulf %128, %6 : vector<1x256xf32>
    %130 = arith.addf %126, %129 : vector<1x256xf32>
    %c6_22 = arith.constant 6 : index
    %131 = memref.load %arg0[%c6_22] : memref<96xf32, #tpu.memory_space<smem>>
    %132 = vector.broadcast %131 : f32 to vector<1x256xf32>
    %133 = arith.mulf %132, %7 : vector<1x256xf32>
    %134 = arith.addf %130, %133 : vector<1x256xf32>
    %c7_23 = arith.constant 7 : index
    %135 = memref.load %arg0[%c7_23] : memref<96xf32, #tpu.memory_space<smem>>
    %136 = vector.broadcast %135 : f32 to vector<1x256xf32>
    %137 = arith.mulf %136, %8 : vector<1x256xf32>
    %138 = arith.addf %134, %137 : vector<1x256xf32>
    %c2_24 = arith.constant 2 : index
    %139 = memref.load %arg1[%c2_24] : memref<48xf32, #tpu.memory_space<smem>>
    %140 = vector.broadcast %139 : f32 to vector<1x256xf32>
    %141 = arith.addf %138, %140 : vector<1x256xf32>
    %cst_25 = arith.constant 0.000000e+00 : f32
    %142 = vector.broadcast %cst_25 : f32 to vector<1x256xf32>
    %143 = arith.maximumf %141, %142 : vector<1x256xf32>
    %c3_26 = arith.constant 3 : index
    %144 = memref.load %arg1[%c3_26] : memref<48xf32, #tpu.memory_space<smem>>
    %145 = vector.broadcast %144 : f32 to vector<1x256xf32>
    %146 = arith.addf %143, %145 : vector<1x256xf32>
    %c8_27 = arith.constant 8 : index
    %147 = memref.load %arg0[%c8_27] : memref<96xf32, #tpu.memory_space<smem>>
    %148 = vector.broadcast %147 : f32 to vector<1x256xf32>
    %149 = arith.mulf %148, %5 : vector<1x256xf32>
    %c9_28 = arith.constant 9 : index
    %150 = memref.load %arg0[%c9_28] : memref<96xf32, #tpu.memory_space<smem>>
    %151 = vector.broadcast %150 : f32 to vector<1x256xf32>
    %152 = arith.mulf %151, %6 : vector<1x256xf32>
    %153 = arith.addf %149, %152 : vector<1x256xf32>
    %c10_29 = arith.constant 10 : index
    %154 = memref.load %arg0[%c10_29] : memref<96xf32, #tpu.memory_space<smem>>
    %155 = vector.broadcast %154 : f32 to vector<1x256xf32>
    %156 = arith.mulf %155, %7 : vector<1x256xf32>
    %157 = arith.addf %153, %156 : vector<1x256xf32>
    %c11_30 = arith.constant 11 : index
    %158 = memref.load %arg0[%c11_30] : memref<96xf32, #tpu.memory_space<smem>>
    %159 = vector.broadcast %158 : f32 to vector<1x256xf32>
    %160 = arith.mulf %159, %8 : vector<1x256xf32>
    %161 = arith.addf %157, %160 : vector<1x256xf32>
    %c4_31 = arith.constant 4 : index
    %162 = memref.load %arg1[%c4_31] : memref<48xf32, #tpu.memory_space<smem>>
    %163 = vector.broadcast %162 : f32 to vector<1x256xf32>
    %164 = arith.addf %161, %163 : vector<1x256xf32>
    %cst_32 = arith.constant 0.000000e+00 : f32
    %165 = vector.broadcast %cst_32 : f32 to vector<1x256xf32>
    %166 = arith.maximumf %164, %165 : vector<1x256xf32>
    %c5_33 = arith.constant 5 : index
    %167 = memref.load %arg1[%c5_33] : memref<48xf32, #tpu.memory_space<smem>>
    %168 = vector.broadcast %167 : f32 to vector<1x256xf32>
    %169 = arith.addf %166, %168 : vector<1x256xf32>
    %c12_34 = arith.constant 12 : index
    %170 = memref.load %arg0[%c12_34] : memref<96xf32, #tpu.memory_space<smem>>
    %171 = vector.broadcast %170 : f32 to vector<1x256xf32>
    %172 = arith.mulf %171, %5 : vector<1x256xf32>
    %c13_35 = arith.constant 13 : index
    %173 = memref.load %arg0[%c13_35] : memref<96xf32, #tpu.memory_space<smem>>
    %174 = vector.broadcast %173 : f32 to vector<1x256xf32>
    %175 = arith.mulf %174, %6 : vector<1x256xf32>
    %176 = arith.addf %172, %175 : vector<1x256xf32>
    %c14_36 = arith.constant 14 : index
    %177 = memref.load %arg0[%c14_36] : memref<96xf32, #tpu.memory_space<smem>>
    %178 = vector.broadcast %177 : f32 to vector<1x256xf32>
    %179 = arith.mulf %178, %7 : vector<1x256xf32>
    %180 = arith.addf %176, %179 : vector<1x256xf32>
    %c15_37 = arith.constant 15 : index
    %181 = memref.load %arg0[%c15_37] : memref<96xf32, #tpu.memory_space<smem>>
    %182 = vector.broadcast %181 : f32 to vector<1x256xf32>
    %183 = arith.mulf %182, %8 : vector<1x256xf32>
    %184 = arith.addf %180, %183 : vector<1x256xf32>
    %c6_38 = arith.constant 6 : index
    %185 = memref.load %arg1[%c6_38] : memref<48xf32, #tpu.memory_space<smem>>
    %186 = vector.broadcast %185 : f32 to vector<1x256xf32>
    %187 = arith.addf %184, %186 : vector<1x256xf32>
    %cst_39 = arith.constant 0.000000e+00 : f32
    %188 = vector.broadcast %cst_39 : f32 to vector<1x256xf32>
    %189 = arith.maximumf %187, %188 : vector<1x256xf32>
    %c7_40 = arith.constant 7 : index
    %190 = memref.load %arg1[%c7_40] : memref<48xf32, #tpu.memory_space<smem>>
    %191 = vector.broadcast %190 : f32 to vector<1x256xf32>
    %192 = arith.addf %189, %191 : vector<1x256xf32>
    %c16 = arith.constant 16 : index
    %193 = memref.load %arg0[%c16] : memref<96xf32, #tpu.memory_space<smem>>
    %194 = vector.broadcast %193 : f32 to vector<1x256xf32>
    %195 = arith.mulf %194, %31 : vector<1x256xf32>
    %c17 = arith.constant 17 : index
    %196 = memref.load %arg0[%c17] : memref<96xf32, #tpu.memory_space<smem>>
    %197 = vector.broadcast %196 : f32 to vector<1x256xf32>
    %198 = arith.mulf %197, %54 : vector<1x256xf32>
    %199 = arith.addf %195, %198 : vector<1x256xf32>
    %c18 = arith.constant 18 : index
    %200 = memref.load %arg0[%c18] : memref<96xf32, #tpu.memory_space<smem>>
    %201 = vector.broadcast %200 : f32 to vector<1x256xf32>
    %202 = arith.mulf %201, %77 : vector<1x256xf32>
    %203 = arith.addf %199, %202 : vector<1x256xf32>
    %c19 = arith.constant 19 : index
    %204 = memref.load %arg0[%c19] : memref<96xf32, #tpu.memory_space<smem>>
    %205 = vector.broadcast %204 : f32 to vector<1x256xf32>
    %206 = arith.mulf %205, %100 : vector<1x256xf32>
    %207 = arith.addf %203, %206 : vector<1x256xf32>
    %c8_41 = arith.constant 8 : index
    %208 = memref.load %arg1[%c8_41] : memref<48xf32, #tpu.memory_space<smem>>
    %209 = vector.broadcast %208 : f32 to vector<1x256xf32>
    %210 = arith.addf %207, %209 : vector<1x256xf32>
    %cst_42 = arith.constant 0.000000e+00 : f32
    %211 = vector.broadcast %cst_42 : f32 to vector<1x256xf32>
    %212 = arith.maximumf %210, %211 : vector<1x256xf32>
    %c9_43 = arith.constant 9 : index
    %213 = memref.load %arg1[%c9_43] : memref<48xf32, #tpu.memory_space<smem>>
    %214 = vector.broadcast %213 : f32 to vector<1x256xf32>
    %215 = arith.addf %212, %214 : vector<1x256xf32>
    %c20 = arith.constant 20 : index
    %216 = memref.load %arg0[%c20] : memref<96xf32, #tpu.memory_space<smem>>
    %217 = vector.broadcast %216 : f32 to vector<1x256xf32>
    %218 = arith.mulf %217, %31 : vector<1x256xf32>
    %c21 = arith.constant 21 : index
    %219 = memref.load %arg0[%c21] : memref<96xf32, #tpu.memory_space<smem>>
    %220 = vector.broadcast %219 : f32 to vector<1x256xf32>
    %221 = arith.mulf %220, %54 : vector<1x256xf32>
    %222 = arith.addf %218, %221 : vector<1x256xf32>
    %c22 = arith.constant 22 : index
    %223 = memref.load %arg0[%c22] : memref<96xf32, #tpu.memory_space<smem>>
    %224 = vector.broadcast %223 : f32 to vector<1x256xf32>
    %225 = arith.mulf %224, %77 : vector<1x256xf32>
    %226 = arith.addf %222, %225 : vector<1x256xf32>
    %c23 = arith.constant 23 : index
    %227 = memref.load %arg0[%c23] : memref<96xf32, #tpu.memory_space<smem>>
    %228 = vector.broadcast %227 : f32 to vector<1x256xf32>
    %229 = arith.mulf %228, %100 : vector<1x256xf32>
    %230 = arith.addf %226, %229 : vector<1x256xf32>
    %c10_44 = arith.constant 10 : index
    %231 = memref.load %arg1[%c10_44] : memref<48xf32, #tpu.memory_space<smem>>
    %232 = vector.broadcast %231 : f32 to vector<1x256xf32>
    %233 = arith.addf %230, %232 : vector<1x256xf32>
    %cst_45 = arith.constant 0.000000e+00 : f32
    %234 = vector.broadcast %cst_45 : f32 to vector<1x256xf32>
    %235 = arith.maximumf %233, %234 : vector<1x256xf32>
    %c11_46 = arith.constant 11 : index
    %236 = memref.load %arg1[%c11_46] : memref<48xf32, #tpu.memory_space<smem>>
    %237 = vector.broadcast %236 : f32 to vector<1x256xf32>
    %238 = arith.addf %235, %237 : vector<1x256xf32>
    %c24 = arith.constant 24 : index
    %239 = memref.load %arg0[%c24] : memref<96xf32, #tpu.memory_space<smem>>
    %240 = vector.broadcast %239 : f32 to vector<1x256xf32>
    %241 = arith.mulf %240, %31 : vector<1x256xf32>
    %c25 = arith.constant 25 : index
    %242 = memref.load %arg0[%c25] : memref<96xf32, #tpu.memory_space<smem>>
    %243 = vector.broadcast %242 : f32 to vector<1x256xf32>
    %244 = arith.mulf %243, %54 : vector<1x256xf32>
    %245 = arith.addf %241, %244 : vector<1x256xf32>
    %c26 = arith.constant 26 : index
    %246 = memref.load %arg0[%c26] : memref<96xf32, #tpu.memory_space<smem>>
    %247 = vector.broadcast %246 : f32 to vector<1x256xf32>
    %248 = arith.mulf %247, %77 : vector<1x256xf32>
    %249 = arith.addf %245, %248 : vector<1x256xf32>
    %c27 = arith.constant 27 : index
    %250 = memref.load %arg0[%c27] : memref<96xf32, #tpu.memory_space<smem>>
    %251 = vector.broadcast %250 : f32 to vector<1x256xf32>
    %252 = arith.mulf %251, %100 : vector<1x256xf32>
    %253 = arith.addf %249, %252 : vector<1x256xf32>
    %c12_47 = arith.constant 12 : index
    %254 = memref.load %arg1[%c12_47] : memref<48xf32, #tpu.memory_space<smem>>
    %255 = vector.broadcast %254 : f32 to vector<1x256xf32>
    %256 = arith.addf %253, %255 : vector<1x256xf32>
    %cst_48 = arith.constant 0.000000e+00 : f32
    %257 = vector.broadcast %cst_48 : f32 to vector<1x256xf32>
    %258 = arith.maximumf %256, %257 : vector<1x256xf32>
    %c13_49 = arith.constant 13 : index
    %259 = memref.load %arg1[%c13_49] : memref<48xf32, #tpu.memory_space<smem>>
    %260 = vector.broadcast %259 : f32 to vector<1x256xf32>
    %261 = arith.addf %258, %260 : vector<1x256xf32>
    %c28 = arith.constant 28 : index
    %262 = memref.load %arg0[%c28] : memref<96xf32, #tpu.memory_space<smem>>
    %263 = vector.broadcast %262 : f32 to vector<1x256xf32>
    %264 = arith.mulf %263, %31 : vector<1x256xf32>
    %c29 = arith.constant 29 : index
    %265 = memref.load %arg0[%c29] : memref<96xf32, #tpu.memory_space<smem>>
    %266 = vector.broadcast %265 : f32 to vector<1x256xf32>
    %267 = arith.mulf %266, %54 : vector<1x256xf32>
    %268 = arith.addf %264, %267 : vector<1x256xf32>
    %c30 = arith.constant 30 : index
    %269 = memref.load %arg0[%c30] : memref<96xf32, #tpu.memory_space<smem>>
    %270 = vector.broadcast %269 : f32 to vector<1x256xf32>
    %271 = arith.mulf %270, %77 : vector<1x256xf32>
    %272 = arith.addf %268, %271 : vector<1x256xf32>
    %c31 = arith.constant 31 : index
    %273 = memref.load %arg0[%c31] : memref<96xf32, #tpu.memory_space<smem>>
    %274 = vector.broadcast %273 : f32 to vector<1x256xf32>
    %275 = arith.mulf %274, %100 : vector<1x256xf32>
    %276 = arith.addf %272, %275 : vector<1x256xf32>
    %c14_50 = arith.constant 14 : index
    %277 = memref.load %arg1[%c14_50] : memref<48xf32, #tpu.memory_space<smem>>
    %278 = vector.broadcast %277 : f32 to vector<1x256xf32>
    %279 = arith.addf %276, %278 : vector<1x256xf32>
    %cst_51 = arith.constant 0.000000e+00 : f32
    %280 = vector.broadcast %cst_51 : f32 to vector<1x256xf32>
    %281 = arith.maximumf %279, %280 : vector<1x256xf32>
    %c15_52 = arith.constant 15 : index
    %282 = memref.load %arg1[%c15_52] : memref<48xf32, #tpu.memory_space<smem>>
    %283 = vector.broadcast %282 : f32 to vector<1x256xf32>
    %284 = arith.addf %281, %283 : vector<1x256xf32>
    %c16_53 = arith.constant 16 : index
    %285 = memref.load %arg0[%c16_53] : memref<96xf32, #tpu.memory_space<smem>>
    %286 = vector.broadcast %285 : f32 to vector<1x256xf32>
    %287 = arith.mulf %286, %123 : vector<1x256xf32>
    %c17_54 = arith.constant 17 : index
    %288 = memref.load %arg0[%c17_54] : memref<96xf32, #tpu.memory_space<smem>>
    %289 = vector.broadcast %288 : f32 to vector<1x256xf32>
    %290 = arith.mulf %289, %146 : vector<1x256xf32>
    %291 = arith.addf %287, %290 : vector<1x256xf32>
    %c18_55 = arith.constant 18 : index
    %292 = memref.load %arg0[%c18_55] : memref<96xf32, #tpu.memory_space<smem>>
    %293 = vector.broadcast %292 : f32 to vector<1x256xf32>
    %294 = arith.mulf %293, %169 : vector<1x256xf32>
    %295 = arith.addf %291, %294 : vector<1x256xf32>
    %c19_56 = arith.constant 19 : index
    %296 = memref.load %arg0[%c19_56] : memref<96xf32, #tpu.memory_space<smem>>
    %297 = vector.broadcast %296 : f32 to vector<1x256xf32>
    %298 = arith.mulf %297, %192 : vector<1x256xf32>
    %299 = arith.addf %295, %298 : vector<1x256xf32>
    %c8_57 = arith.constant 8 : index
    %300 = memref.load %arg1[%c8_57] : memref<48xf32, #tpu.memory_space<smem>>
    %301 = vector.broadcast %300 : f32 to vector<1x256xf32>
    %302 = arith.addf %299, %301 : vector<1x256xf32>
    %cst_58 = arith.constant 0.000000e+00 : f32
    %303 = vector.broadcast %cst_58 : f32 to vector<1x256xf32>
    %304 = arith.maximumf %302, %303 : vector<1x256xf32>
    %c9_59 = arith.constant 9 : index
    %305 = memref.load %arg1[%c9_59] : memref<48xf32, #tpu.memory_space<smem>>
    %306 = vector.broadcast %305 : f32 to vector<1x256xf32>
    %307 = arith.addf %304, %306 : vector<1x256xf32>
    %c20_60 = arith.constant 20 : index
    %308 = memref.load %arg0[%c20_60] : memref<96xf32, #tpu.memory_space<smem>>
    %309 = vector.broadcast %308 : f32 to vector<1x256xf32>
    %310 = arith.mulf %309, %123 : vector<1x256xf32>
    %c21_61 = arith.constant 21 : index
    %311 = memref.load %arg0[%c21_61] : memref<96xf32, #tpu.memory_space<smem>>
    %312 = vector.broadcast %311 : f32 to vector<1x256xf32>
    %313 = arith.mulf %312, %146 : vector<1x256xf32>
    %314 = arith.addf %310, %313 : vector<1x256xf32>
    %c22_62 = arith.constant 22 : index
    %315 = memref.load %arg0[%c22_62] : memref<96xf32, #tpu.memory_space<smem>>
    %316 = vector.broadcast %315 : f32 to vector<1x256xf32>
    %317 = arith.mulf %316, %169 : vector<1x256xf32>
    %318 = arith.addf %314, %317 : vector<1x256xf32>
    %c23_63 = arith.constant 23 : index
    %319 = memref.load %arg0[%c23_63] : memref<96xf32, #tpu.memory_space<smem>>
    %320 = vector.broadcast %319 : f32 to vector<1x256xf32>
    %321 = arith.mulf %320, %192 : vector<1x256xf32>
    %322 = arith.addf %318, %321 : vector<1x256xf32>
    %c10_64 = arith.constant 10 : index
    %323 = memref.load %arg1[%c10_64] : memref<48xf32, #tpu.memory_space<smem>>
    %324 = vector.broadcast %323 : f32 to vector<1x256xf32>
    %325 = arith.addf %322, %324 : vector<1x256xf32>
    %cst_65 = arith.constant 0.000000e+00 : f32
    %326 = vector.broadcast %cst_65 : f32 to vector<1x256xf32>
    %327 = arith.maximumf %325, %326 : vector<1x256xf32>
    %c11_66 = arith.constant 11 : index
    %328 = memref.load %arg1[%c11_66] : memref<48xf32, #tpu.memory_space<smem>>
    %329 = vector.broadcast %328 : f32 to vector<1x256xf32>
    %330 = arith.addf %327, %329 : vector<1x256xf32>
    %c24_67 = arith.constant 24 : index
    %331 = memref.load %arg0[%c24_67] : memref<96xf32, #tpu.memory_space<smem>>
    %332 = vector.broadcast %331 : f32 to vector<1x256xf32>
    %333 = arith.mulf %332, %123 : vector<1x256xf32>
    %c25_68 = arith.constant 25 : index
    %334 = memref.load %arg0[%c25_68] : memref<96xf32, #tpu.memory_space<smem>>
    %335 = vector.broadcast %334 : f32 to vector<1x256xf32>
    %336 = arith.mulf %335, %146 : vector<1x256xf32>
    %337 = arith.addf %333, %336 : vector<1x256xf32>
    %c26_69 = arith.constant 26 : index
    %338 = memref.load %arg0[%c26_69] : memref<96xf32, #tpu.memory_space<smem>>
    %339 = vector.broadcast %338 : f32 to vector<1x256xf32>
    %340 = arith.mulf %339, %169 : vector<1x256xf32>
    %341 = arith.addf %337, %340 : vector<1x256xf32>
    %c27_70 = arith.constant 27 : index
    %342 = memref.load %arg0[%c27_70] : memref<96xf32, #tpu.memory_space<smem>>
    %343 = vector.broadcast %342 : f32 to vector<1x256xf32>
    %344 = arith.mulf %343, %192 : vector<1x256xf32>
    %345 = arith.addf %341, %344 : vector<1x256xf32>
    %c12_71 = arith.constant 12 : index
    %346 = memref.load %arg1[%c12_71] : memref<48xf32, #tpu.memory_space<smem>>
    %347 = vector.broadcast %346 : f32 to vector<1x256xf32>
    %348 = arith.addf %345, %347 : vector<1x256xf32>
    %cst_72 = arith.constant 0.000000e+00 : f32
    %349 = vector.broadcast %cst_72 : f32 to vector<1x256xf32>
    %350 = arith.maximumf %348, %349 : vector<1x256xf32>
    %c13_73 = arith.constant 13 : index
    %351 = memref.load %arg1[%c13_73] : memref<48xf32, #tpu.memory_space<smem>>
    %352 = vector.broadcast %351 : f32 to vector<1x256xf32>
    %353 = arith.addf %350, %352 : vector<1x256xf32>
    %c28_74 = arith.constant 28 : index
    %354 = memref.load %arg0[%c28_74] : memref<96xf32, #tpu.memory_space<smem>>
    %355 = vector.broadcast %354 : f32 to vector<1x256xf32>
    %356 = arith.mulf %355, %123 : vector<1x256xf32>
    %c29_75 = arith.constant 29 : index
    %357 = memref.load %arg0[%c29_75] : memref<96xf32, #tpu.memory_space<smem>>
    %358 = vector.broadcast %357 : f32 to vector<1x256xf32>
    %359 = arith.mulf %358, %146 : vector<1x256xf32>
    %360 = arith.addf %356, %359 : vector<1x256xf32>
    %c30_76 = arith.constant 30 : index
    %361 = memref.load %arg0[%c30_76] : memref<96xf32, #tpu.memory_space<smem>>
    %362 = vector.broadcast %361 : f32 to vector<1x256xf32>
    %363 = arith.mulf %362, %169 : vector<1x256xf32>
    %364 = arith.addf %360, %363 : vector<1x256xf32>
    %c31_77 = arith.constant 31 : index
    %365 = memref.load %arg0[%c31_77] : memref<96xf32, #tpu.memory_space<smem>>
    %366 = vector.broadcast %365 : f32 to vector<1x256xf32>
    %367 = arith.mulf %366, %192 : vector<1x256xf32>
    %368 = arith.addf %364, %367 : vector<1x256xf32>
    %c14_78 = arith.constant 14 : index
    %369 = memref.load %arg1[%c14_78] : memref<48xf32, #tpu.memory_space<smem>>
    %370 = vector.broadcast %369 : f32 to vector<1x256xf32>
    %371 = arith.addf %368, %370 : vector<1x256xf32>
    %cst_79 = arith.constant 0.000000e+00 : f32
    %372 = vector.broadcast %cst_79 : f32 to vector<1x256xf32>
    %373 = arith.maximumf %371, %372 : vector<1x256xf32>
    %c15_80 = arith.constant 15 : index
    %374 = memref.load %arg1[%c15_80] : memref<48xf32, #tpu.memory_space<smem>>
    %375 = vector.broadcast %374 : f32 to vector<1x256xf32>
    %376 = arith.addf %373, %375 : vector<1x256xf32>
    %c32 = arith.constant 32 : index
    %377 = memref.load %arg0[%c32] : memref<96xf32, #tpu.memory_space<smem>>
    %378 = vector.broadcast %377 : f32 to vector<1x256xf32>
    %379 = arith.mulf %378, %215 : vector<1x256xf32>
    %c33 = arith.constant 33 : index
    %380 = memref.load %arg0[%c33] : memref<96xf32, #tpu.memory_space<smem>>
    %381 = vector.broadcast %380 : f32 to vector<1x256xf32>
    %382 = arith.mulf %381, %238 : vector<1x256xf32>
    %383 = arith.addf %379, %382 : vector<1x256xf32>
    %c34 = arith.constant 34 : index
    %384 = memref.load %arg0[%c34] : memref<96xf32, #tpu.memory_space<smem>>
    %385 = vector.broadcast %384 : f32 to vector<1x256xf32>
    %386 = arith.mulf %385, %261 : vector<1x256xf32>
    %387 = arith.addf %383, %386 : vector<1x256xf32>
    %c35 = arith.constant 35 : index
    %388 = memref.load %arg0[%c35] : memref<96xf32, #tpu.memory_space<smem>>
    %389 = vector.broadcast %388 : f32 to vector<1x256xf32>
    %390 = arith.mulf %389, %284 : vector<1x256xf32>
    %391 = arith.addf %387, %390 : vector<1x256xf32>
    %c16_81 = arith.constant 16 : index
    %392 = memref.load %arg1[%c16_81] : memref<48xf32, #tpu.memory_space<smem>>
    %393 = vector.broadcast %392 : f32 to vector<1x256xf32>
    %394 = arith.addf %391, %393 : vector<1x256xf32>
    %cst_82 = arith.constant 0.000000e+00 : f32
    %395 = vector.broadcast %cst_82 : f32 to vector<1x256xf32>
    %396 = arith.maximumf %394, %395 : vector<1x256xf32>
    %c17_83 = arith.constant 17 : index
    %397 = memref.load %arg1[%c17_83] : memref<48xf32, #tpu.memory_space<smem>>
    %398 = vector.broadcast %397 : f32 to vector<1x256xf32>
    %399 = arith.addf %396, %398 : vector<1x256xf32>
    %c36 = arith.constant 36 : index
    %400 = memref.load %arg0[%c36] : memref<96xf32, #tpu.memory_space<smem>>
    %401 = vector.broadcast %400 : f32 to vector<1x256xf32>
    %402 = arith.mulf %401, %215 : vector<1x256xf32>
    %c37 = arith.constant 37 : index
    %403 = memref.load %arg0[%c37] : memref<96xf32, #tpu.memory_space<smem>>
    %404 = vector.broadcast %403 : f32 to vector<1x256xf32>
    %405 = arith.mulf %404, %238 : vector<1x256xf32>
    %406 = arith.addf %402, %405 : vector<1x256xf32>
    %c38 = arith.constant 38 : index
    %407 = memref.load %arg0[%c38] : memref<96xf32, #tpu.memory_space<smem>>
    %408 = vector.broadcast %407 : f32 to vector<1x256xf32>
    %409 = arith.mulf %408, %261 : vector<1x256xf32>
    %410 = arith.addf %406, %409 : vector<1x256xf32>
    %c39 = arith.constant 39 : index
    %411 = memref.load %arg0[%c39] : memref<96xf32, #tpu.memory_space<smem>>
    %412 = vector.broadcast %411 : f32 to vector<1x256xf32>
    %413 = arith.mulf %412, %284 : vector<1x256xf32>
    %414 = arith.addf %410, %413 : vector<1x256xf32>
    %c18_84 = arith.constant 18 : index
    %415 = memref.load %arg1[%c18_84] : memref<48xf32, #tpu.memory_space<smem>>
    %416 = vector.broadcast %415 : f32 to vector<1x256xf32>
    %417 = arith.addf %414, %416 : vector<1x256xf32>
    %cst_85 = arith.constant 0.000000e+00 : f32
    %418 = vector.broadcast %cst_85 : f32 to vector<1x256xf32>
    %419 = arith.maximumf %417, %418 : vector<1x256xf32>
    %c19_86 = arith.constant 19 : index
    %420 = memref.load %arg1[%c19_86] : memref<48xf32, #tpu.memory_space<smem>>
    %421 = vector.broadcast %420 : f32 to vector<1x256xf32>
    %422 = arith.addf %419, %421 : vector<1x256xf32>
    %c40 = arith.constant 40 : index
    %423 = memref.load %arg0[%c40] : memref<96xf32, #tpu.memory_space<smem>>
    %424 = vector.broadcast %423 : f32 to vector<1x256xf32>
    %425 = arith.mulf %424, %215 : vector<1x256xf32>
    %c41 = arith.constant 41 : index
    %426 = memref.load %arg0[%c41] : memref<96xf32, #tpu.memory_space<smem>>
    %427 = vector.broadcast %426 : f32 to vector<1x256xf32>
    %428 = arith.mulf %427, %238 : vector<1x256xf32>
    %429 = arith.addf %425, %428 : vector<1x256xf32>
    %c42 = arith.constant 42 : index
    %430 = memref.load %arg0[%c42] : memref<96xf32, #tpu.memory_space<smem>>
    %431 = vector.broadcast %430 : f32 to vector<1x256xf32>
    %432 = arith.mulf %431, %261 : vector<1x256xf32>
    %433 = arith.addf %429, %432 : vector<1x256xf32>
    %c43 = arith.constant 43 : index
    %434 = memref.load %arg0[%c43] : memref<96xf32, #tpu.memory_space<smem>>
    %435 = vector.broadcast %434 : f32 to vector<1x256xf32>
    %436 = arith.mulf %435, %284 : vector<1x256xf32>
    %437 = arith.addf %433, %436 : vector<1x256xf32>
    %c20_87 = arith.constant 20 : index
    %438 = memref.load %arg1[%c20_87] : memref<48xf32, #tpu.memory_space<smem>>
    %439 = vector.broadcast %438 : f32 to vector<1x256xf32>
    %440 = arith.addf %437, %439 : vector<1x256xf32>
    %cst_88 = arith.constant 0.000000e+00 : f32
    %441 = vector.broadcast %cst_88 : f32 to vector<1x256xf32>
    %442 = arith.maximumf %440, %441 : vector<1x256xf32>
    %c21_89 = arith.constant 21 : index
    %443 = memref.load %arg1[%c21_89] : memref<48xf32, #tpu.memory_space<smem>>
    %444 = vector.broadcast %443 : f32 to vector<1x256xf32>
    %445 = arith.addf %442, %444 : vector<1x256xf32>
    %c44 = arith.constant 44 : index
    %446 = memref.load %arg0[%c44] : memref<96xf32, #tpu.memory_space<smem>>
    %447 = vector.broadcast %446 : f32 to vector<1x256xf32>
    %448 = arith.mulf %447, %215 : vector<1x256xf32>
    %c45 = arith.constant 45 : index
    %449 = memref.load %arg0[%c45] : memref<96xf32, #tpu.memory_space<smem>>
    %450 = vector.broadcast %449 : f32 to vector<1x256xf32>
    %451 = arith.mulf %450, %238 : vector<1x256xf32>
    %452 = arith.addf %448, %451 : vector<1x256xf32>
    %c46 = arith.constant 46 : index
    %453 = memref.load %arg0[%c46] : memref<96xf32, #tpu.memory_space<smem>>
    %454 = vector.broadcast %453 : f32 to vector<1x256xf32>
    %455 = arith.mulf %454, %261 : vector<1x256xf32>
    %456 = arith.addf %452, %455 : vector<1x256xf32>
    %c47 = arith.constant 47 : index
    %457 = memref.load %arg0[%c47] : memref<96xf32, #tpu.memory_space<smem>>
    %458 = vector.broadcast %457 : f32 to vector<1x256xf32>
    %459 = arith.mulf %458, %284 : vector<1x256xf32>
    %460 = arith.addf %456, %459 : vector<1x256xf32>
    %c22_90 = arith.constant 22 : index
    %461 = memref.load %arg1[%c22_90] : memref<48xf32, #tpu.memory_space<smem>>
    %462 = vector.broadcast %461 : f32 to vector<1x256xf32>
    %463 = arith.addf %460, %462 : vector<1x256xf32>
    %cst_91 = arith.constant 0.000000e+00 : f32
    %464 = vector.broadcast %cst_91 : f32 to vector<1x256xf32>
    %465 = arith.maximumf %463, %464 : vector<1x256xf32>
    %c23_92 = arith.constant 23 : index
    %466 = memref.load %arg1[%c23_92] : memref<48xf32, #tpu.memory_space<smem>>
    %467 = vector.broadcast %466 : f32 to vector<1x256xf32>
    %468 = arith.addf %465, %467 : vector<1x256xf32>
    %c32_93 = arith.constant 32 : index
    %469 = memref.load %arg0[%c32_93] : memref<96xf32, #tpu.memory_space<smem>>
    %470 = vector.broadcast %469 : f32 to vector<1x256xf32>
    %471 = arith.mulf %470, %307 : vector<1x256xf32>
    %c33_94 = arith.constant 33 : index
    %472 = memref.load %arg0[%c33_94] : memref<96xf32, #tpu.memory_space<smem>>
    %473 = vector.broadcast %472 : f32 to vector<1x256xf32>
    %474 = arith.mulf %473, %330 : vector<1x256xf32>
    %475 = arith.addf %471, %474 : vector<1x256xf32>
    %c34_95 = arith.constant 34 : index
    %476 = memref.load %arg0[%c34_95] : memref<96xf32, #tpu.memory_space<smem>>
    %477 = vector.broadcast %476 : f32 to vector<1x256xf32>
    %478 = arith.mulf %477, %353 : vector<1x256xf32>
    %479 = arith.addf %475, %478 : vector<1x256xf32>
    %c35_96 = arith.constant 35 : index
    %480 = memref.load %arg0[%c35_96] : memref<96xf32, #tpu.memory_space<smem>>
    %481 = vector.broadcast %480 : f32 to vector<1x256xf32>
    %482 = arith.mulf %481, %376 : vector<1x256xf32>
    %483 = arith.addf %479, %482 : vector<1x256xf32>
    %c16_97 = arith.constant 16 : index
    %484 = memref.load %arg1[%c16_97] : memref<48xf32, #tpu.memory_space<smem>>
    %485 = vector.broadcast %484 : f32 to vector<1x256xf32>
    %486 = arith.addf %483, %485 : vector<1x256xf32>
    %cst_98 = arith.constant 0.000000e+00 : f32
    %487 = vector.broadcast %cst_98 : f32 to vector<1x256xf32>
    %488 = arith.maximumf %486, %487 : vector<1x256xf32>
    %c17_99 = arith.constant 17 : index
    %489 = memref.load %arg1[%c17_99] : memref<48xf32, #tpu.memory_space<smem>>
    %490 = vector.broadcast %489 : f32 to vector<1x256xf32>
    %491 = arith.addf %488, %490 : vector<1x256xf32>
    %c36_100 = arith.constant 36 : index
    %492 = memref.load %arg0[%c36_100] : memref<96xf32, #tpu.memory_space<smem>>
    %493 = vector.broadcast %492 : f32 to vector<1x256xf32>
    %494 = arith.mulf %493, %307 : vector<1x256xf32>
    %c37_101 = arith.constant 37 : index
    %495 = memref.load %arg0[%c37_101] : memref<96xf32, #tpu.memory_space<smem>>
    %496 = vector.broadcast %495 : f32 to vector<1x256xf32>
    %497 = arith.mulf %496, %330 : vector<1x256xf32>
    %498 = arith.addf %494, %497 : vector<1x256xf32>
    %c38_102 = arith.constant 38 : index
    %499 = memref.load %arg0[%c38_102] : memref<96xf32, #tpu.memory_space<smem>>
    %500 = vector.broadcast %499 : f32 to vector<1x256xf32>
    %501 = arith.mulf %500, %353 : vector<1x256xf32>
    %502 = arith.addf %498, %501 : vector<1x256xf32>
    %c39_103 = arith.constant 39 : index
    %503 = memref.load %arg0[%c39_103] : memref<96xf32, #tpu.memory_space<smem>>
    %504 = vector.broadcast %503 : f32 to vector<1x256xf32>
    %505 = arith.mulf %504, %376 : vector<1x256xf32>
    %506 = arith.addf %502, %505 : vector<1x256xf32>
    %c18_104 = arith.constant 18 : index
    %507 = memref.load %arg1[%c18_104] : memref<48xf32, #tpu.memory_space<smem>>
    %508 = vector.broadcast %507 : f32 to vector<1x256xf32>
    %509 = arith.addf %506, %508 : vector<1x256xf32>
    %cst_105 = arith.constant 0.000000e+00 : f32
    %510 = vector.broadcast %cst_105 : f32 to vector<1x256xf32>
    %511 = arith.maximumf %509, %510 : vector<1x256xf32>
    %c19_106 = arith.constant 19 : index
    %512 = memref.load %arg1[%c19_106] : memref<48xf32, #tpu.memory_space<smem>>
    %513 = vector.broadcast %512 : f32 to vector<1x256xf32>
    %514 = arith.addf %511, %513 : vector<1x256xf32>
    %c40_107 = arith.constant 40 : index
    %515 = memref.load %arg0[%c40_107] : memref<96xf32, #tpu.memory_space<smem>>
    %516 = vector.broadcast %515 : f32 to vector<1x256xf32>
    %517 = arith.mulf %516, %307 : vector<1x256xf32>
    %c41_108 = arith.constant 41 : index
    %518 = memref.load %arg0[%c41_108] : memref<96xf32, #tpu.memory_space<smem>>
    %519 = vector.broadcast %518 : f32 to vector<1x256xf32>
    %520 = arith.mulf %519, %330 : vector<1x256xf32>
    %521 = arith.addf %517, %520 : vector<1x256xf32>
    %c42_109 = arith.constant 42 : index
    %522 = memref.load %arg0[%c42_109] : memref<96xf32, #tpu.memory_space<smem>>
    %523 = vector.broadcast %522 : f32 to vector<1x256xf32>
    %524 = arith.mulf %523, %353 : vector<1x256xf32>
    %525 = arith.addf %521, %524 : vector<1x256xf32>
    %c43_110 = arith.constant 43 : index
    %526 = memref.load %arg0[%c43_110] : memref<96xf32, #tpu.memory_space<smem>>
    %527 = vector.broadcast %526 : f32 to vector<1x256xf32>
    %528 = arith.mulf %527, %376 : vector<1x256xf32>
    %529 = arith.addf %525, %528 : vector<1x256xf32>
    %c20_111 = arith.constant 20 : index
    %530 = memref.load %arg1[%c20_111] : memref<48xf32, #tpu.memory_space<smem>>
    %531 = vector.broadcast %530 : f32 to vector<1x256xf32>
    %532 = arith.addf %529, %531 : vector<1x256xf32>
    %cst_112 = arith.constant 0.000000e+00 : f32
    %533 = vector.broadcast %cst_112 : f32 to vector<1x256xf32>
    %534 = arith.maximumf %532, %533 : vector<1x256xf32>
    %c21_113 = arith.constant 21 : index
    %535 = memref.load %arg1[%c21_113] : memref<48xf32, #tpu.memory_space<smem>>
    %536 = vector.broadcast %535 : f32 to vector<1x256xf32>
    %537 = arith.addf %534, %536 : vector<1x256xf32>
    %c44_114 = arith.constant 44 : index
    %538 = memref.load %arg0[%c44_114] : memref<96xf32, #tpu.memory_space<smem>>
    %539 = vector.broadcast %538 : f32 to vector<1x256xf32>
    %540 = arith.mulf %539, %307 : vector<1x256xf32>
    %c45_115 = arith.constant 45 : index
    %541 = memref.load %arg0[%c45_115] : memref<96xf32, #tpu.memory_space<smem>>
    %542 = vector.broadcast %541 : f32 to vector<1x256xf32>
    %543 = arith.mulf %542, %330 : vector<1x256xf32>
    %544 = arith.addf %540, %543 : vector<1x256xf32>
    %c46_116 = arith.constant 46 : index
    %545 = memref.load %arg0[%c46_116] : memref<96xf32, #tpu.memory_space<smem>>
    %546 = vector.broadcast %545 : f32 to vector<1x256xf32>
    %547 = arith.mulf %546, %353 : vector<1x256xf32>
    %548 = arith.addf %544, %547 : vector<1x256xf32>
    %c47_117 = arith.constant 47 : index
    %549 = memref.load %arg0[%c47_117] : memref<96xf32, #tpu.memory_space<smem>>
    %550 = vector.broadcast %549 : f32 to vector<1x256xf32>
    %551 = arith.mulf %550, %376 : vector<1x256xf32>
    %552 = arith.addf %548, %551 : vector<1x256xf32>
    %c22_118 = arith.constant 22 : index
    %553 = memref.load %arg1[%c22_118] : memref<48xf32, #tpu.memory_space<smem>>
    %554 = vector.broadcast %553 : f32 to vector<1x256xf32>
    %555 = arith.addf %552, %554 : vector<1x256xf32>
    %cst_119 = arith.constant 0.000000e+00 : f32
    %556 = vector.broadcast %cst_119 : f32 to vector<1x256xf32>
    %557 = arith.maximumf %555, %556 : vector<1x256xf32>
    %c23_120 = arith.constant 23 : index
    %558 = memref.load %arg1[%c23_120] : memref<48xf32, #tpu.memory_space<smem>>
    %559 = vector.broadcast %558 : f32 to vector<1x256xf32>
    %560 = arith.addf %557, %559 : vector<1x256xf32>
    %c48 = arith.constant 48 : index
    %561 = memref.load %arg0[%c48] : memref<96xf32, #tpu.memory_space<smem>>
    %562 = vector.broadcast %561 : f32 to vector<1x256xf32>
    %563 = arith.mulf %562, %399 : vector<1x256xf32>
    %c49 = arith.constant 49 : index
    %564 = memref.load %arg0[%c49] : memref<96xf32, #tpu.memory_space<smem>>
    %565 = vector.broadcast %564 : f32 to vector<1x256xf32>
    %566 = arith.mulf %565, %422 : vector<1x256xf32>
    %567 = arith.addf %563, %566 : vector<1x256xf32>
    %c50 = arith.constant 50 : index
    %568 = memref.load %arg0[%c50] : memref<96xf32, #tpu.memory_space<smem>>
    %569 = vector.broadcast %568 : f32 to vector<1x256xf32>
    %570 = arith.mulf %569, %445 : vector<1x256xf32>
    %571 = arith.addf %567, %570 : vector<1x256xf32>
    %c51 = arith.constant 51 : index
    %572 = memref.load %arg0[%c51] : memref<96xf32, #tpu.memory_space<smem>>
    %573 = vector.broadcast %572 : f32 to vector<1x256xf32>
    %574 = arith.mulf %573, %468 : vector<1x256xf32>
    %575 = arith.addf %571, %574 : vector<1x256xf32>
    %c24_121 = arith.constant 24 : index
    %576 = memref.load %arg1[%c24_121] : memref<48xf32, #tpu.memory_space<smem>>
    %577 = vector.broadcast %576 : f32 to vector<1x256xf32>
    %578 = arith.addf %575, %577 : vector<1x256xf32>
    %cst_122 = arith.constant 0.000000e+00 : f32
    %579 = vector.broadcast %cst_122 : f32 to vector<1x256xf32>
    %580 = arith.maximumf %578, %579 : vector<1x256xf32>
    %c25_123 = arith.constant 25 : index
    %581 = memref.load %arg1[%c25_123] : memref<48xf32, #tpu.memory_space<smem>>
    %582 = vector.broadcast %581 : f32 to vector<1x256xf32>
    %583 = arith.addf %580, %582 : vector<1x256xf32>
    %c52 = arith.constant 52 : index
    %584 = memref.load %arg0[%c52] : memref<96xf32, #tpu.memory_space<smem>>
    %585 = vector.broadcast %584 : f32 to vector<1x256xf32>
    %586 = arith.mulf %585, %399 : vector<1x256xf32>
    %c53 = arith.constant 53 : index
    %587 = memref.load %arg0[%c53] : memref<96xf32, #tpu.memory_space<smem>>
    %588 = vector.broadcast %587 : f32 to vector<1x256xf32>
    %589 = arith.mulf %588, %422 : vector<1x256xf32>
    %590 = arith.addf %586, %589 : vector<1x256xf32>
    %c54 = arith.constant 54 : index
    %591 = memref.load %arg0[%c54] : memref<96xf32, #tpu.memory_space<smem>>
    %592 = vector.broadcast %591 : f32 to vector<1x256xf32>
    %593 = arith.mulf %592, %445 : vector<1x256xf32>
    %594 = arith.addf %590, %593 : vector<1x256xf32>
    %c55 = arith.constant 55 : index
    %595 = memref.load %arg0[%c55] : memref<96xf32, #tpu.memory_space<smem>>
    %596 = vector.broadcast %595 : f32 to vector<1x256xf32>
    %597 = arith.mulf %596, %468 : vector<1x256xf32>
    %598 = arith.addf %594, %597 : vector<1x256xf32>
    %c26_124 = arith.constant 26 : index
    %599 = memref.load %arg1[%c26_124] : memref<48xf32, #tpu.memory_space<smem>>
    %600 = vector.broadcast %599 : f32 to vector<1x256xf32>
    %601 = arith.addf %598, %600 : vector<1x256xf32>
    %cst_125 = arith.constant 0.000000e+00 : f32
    %602 = vector.broadcast %cst_125 : f32 to vector<1x256xf32>
    %603 = arith.maximumf %601, %602 : vector<1x256xf32>
    %c27_126 = arith.constant 27 : index
    %604 = memref.load %arg1[%c27_126] : memref<48xf32, #tpu.memory_space<smem>>
    %605 = vector.broadcast %604 : f32 to vector<1x256xf32>
    %606 = arith.addf %603, %605 : vector<1x256xf32>
    %c56 = arith.constant 56 : index
    %607 = memref.load %arg0[%c56] : memref<96xf32, #tpu.memory_space<smem>>
    %608 = vector.broadcast %607 : f32 to vector<1x256xf32>
    %609 = arith.mulf %608, %399 : vector<1x256xf32>
    %c57 = arith.constant 57 : index
    %610 = memref.load %arg0[%c57] : memref<96xf32, #tpu.memory_space<smem>>
    %611 = vector.broadcast %610 : f32 to vector<1x256xf32>
    %612 = arith.mulf %611, %422 : vector<1x256xf32>
    %613 = arith.addf %609, %612 : vector<1x256xf32>
    %c58 = arith.constant 58 : index
    %614 = memref.load %arg0[%c58] : memref<96xf32, #tpu.memory_space<smem>>
    %615 = vector.broadcast %614 : f32 to vector<1x256xf32>
    %616 = arith.mulf %615, %445 : vector<1x256xf32>
    %617 = arith.addf %613, %616 : vector<1x256xf32>
    %c59 = arith.constant 59 : index
    %618 = memref.load %arg0[%c59] : memref<96xf32, #tpu.memory_space<smem>>
    %619 = vector.broadcast %618 : f32 to vector<1x256xf32>
    %620 = arith.mulf %619, %468 : vector<1x256xf32>
    %621 = arith.addf %617, %620 : vector<1x256xf32>
    %c28_127 = arith.constant 28 : index
    %622 = memref.load %arg1[%c28_127] : memref<48xf32, #tpu.memory_space<smem>>
    %623 = vector.broadcast %622 : f32 to vector<1x256xf32>
    %624 = arith.addf %621, %623 : vector<1x256xf32>
    %cst_128 = arith.constant 0.000000e+00 : f32
    %625 = vector.broadcast %cst_128 : f32 to vector<1x256xf32>
    %626 = arith.maximumf %624, %625 : vector<1x256xf32>
    %c29_129 = arith.constant 29 : index
    %627 = memref.load %arg1[%c29_129] : memref<48xf32, #tpu.memory_space<smem>>
    %628 = vector.broadcast %627 : f32 to vector<1x256xf32>
    %629 = arith.addf %626, %628 : vector<1x256xf32>
    %c60 = arith.constant 60 : index
    %630 = memref.load %arg0[%c60] : memref<96xf32, #tpu.memory_space<smem>>
    %631 = vector.broadcast %630 : f32 to vector<1x256xf32>
    %632 = arith.mulf %631, %399 : vector<1x256xf32>
    %c61 = arith.constant 61 : index
    %633 = memref.load %arg0[%c61] : memref<96xf32, #tpu.memory_space<smem>>
    %634 = vector.broadcast %633 : f32 to vector<1x256xf32>
    %635 = arith.mulf %634, %422 : vector<1x256xf32>
    %636 = arith.addf %632, %635 : vector<1x256xf32>
    %c62 = arith.constant 62 : index
    %637 = memref.load %arg0[%c62] : memref<96xf32, #tpu.memory_space<smem>>
    %638 = vector.broadcast %637 : f32 to vector<1x256xf32>
    %639 = arith.mulf %638, %445 : vector<1x256xf32>
    %640 = arith.addf %636, %639 : vector<1x256xf32>
    %c63 = arith.constant 63 : index
    %641 = memref.load %arg0[%c63] : memref<96xf32, #tpu.memory_space<smem>>
    %642 = vector.broadcast %641 : f32 to vector<1x256xf32>
    %643 = arith.mulf %642, %468 : vector<1x256xf32>
    %644 = arith.addf %640, %643 : vector<1x256xf32>
    %c30_130 = arith.constant 30 : index
    %645 = memref.load %arg1[%c30_130] : memref<48xf32, #tpu.memory_space<smem>>
    %646 = vector.broadcast %645 : f32 to vector<1x256xf32>
    %647 = arith.addf %644, %646 : vector<1x256xf32>
    %cst_131 = arith.constant 0.000000e+00 : f32
    %648 = vector.broadcast %cst_131 : f32 to vector<1x256xf32>
    %649 = arith.maximumf %647, %648 : vector<1x256xf32>
    %c31_132 = arith.constant 31 : index
    %650 = memref.load %arg1[%c31_132] : memref<48xf32, #tpu.memory_space<smem>>
    %651 = vector.broadcast %650 : f32 to vector<1x256xf32>
    %652 = arith.addf %649, %651 : vector<1x256xf32>
    %c48_133 = arith.constant 48 : index
    %653 = memref.load %arg0[%c48_133] : memref<96xf32, #tpu.memory_space<smem>>
    %654 = vector.broadcast %653 : f32 to vector<1x256xf32>
    %655 = arith.mulf %654, %491 : vector<1x256xf32>
    %c49_134 = arith.constant 49 : index
    %656 = memref.load %arg0[%c49_134] : memref<96xf32, #tpu.memory_space<smem>>
    %657 = vector.broadcast %656 : f32 to vector<1x256xf32>
    %658 = arith.mulf %657, %514 : vector<1x256xf32>
    %659 = arith.addf %655, %658 : vector<1x256xf32>
    %c50_135 = arith.constant 50 : index
    %660 = memref.load %arg0[%c50_135] : memref<96xf32, #tpu.memory_space<smem>>
    %661 = vector.broadcast %660 : f32 to vector<1x256xf32>
    %662 = arith.mulf %661, %537 : vector<1x256xf32>
    %663 = arith.addf %659, %662 : vector<1x256xf32>
    %c51_136 = arith.constant 51 : index
    %664 = memref.load %arg0[%c51_136] : memref<96xf32, #tpu.memory_space<smem>>
    %665 = vector.broadcast %664 : f32 to vector<1x256xf32>
    %666 = arith.mulf %665, %560 : vector<1x256xf32>
    %667 = arith.addf %663, %666 : vector<1x256xf32>
    %c24_137 = arith.constant 24 : index
    %668 = memref.load %arg1[%c24_137] : memref<48xf32, #tpu.memory_space<smem>>
    %669 = vector.broadcast %668 : f32 to vector<1x256xf32>
    %670 = arith.addf %667, %669 : vector<1x256xf32>
    %cst_138 = arith.constant 0.000000e+00 : f32
    %671 = vector.broadcast %cst_138 : f32 to vector<1x256xf32>
    %672 = arith.maximumf %670, %671 : vector<1x256xf32>
    %c25_139 = arith.constant 25 : index
    %673 = memref.load %arg1[%c25_139] : memref<48xf32, #tpu.memory_space<smem>>
    %674 = vector.broadcast %673 : f32 to vector<1x256xf32>
    %675 = arith.addf %672, %674 : vector<1x256xf32>
    %c52_140 = arith.constant 52 : index
    %676 = memref.load %arg0[%c52_140] : memref<96xf32, #tpu.memory_space<smem>>
    %677 = vector.broadcast %676 : f32 to vector<1x256xf32>
    %678 = arith.mulf %677, %491 : vector<1x256xf32>
    %c53_141 = arith.constant 53 : index
    %679 = memref.load %arg0[%c53_141] : memref<96xf32, #tpu.memory_space<smem>>
    %680 = vector.broadcast %679 : f32 to vector<1x256xf32>
    %681 = arith.mulf %680, %514 : vector<1x256xf32>
    %682 = arith.addf %678, %681 : vector<1x256xf32>
    %c54_142 = arith.constant 54 : index
    %683 = memref.load %arg0[%c54_142] : memref<96xf32, #tpu.memory_space<smem>>
    %684 = vector.broadcast %683 : f32 to vector<1x256xf32>
    %685 = arith.mulf %684, %537 : vector<1x256xf32>
    %686 = arith.addf %682, %685 : vector<1x256xf32>
    %c55_143 = arith.constant 55 : index
    %687 = memref.load %arg0[%c55_143] : memref<96xf32, #tpu.memory_space<smem>>
    %688 = vector.broadcast %687 : f32 to vector<1x256xf32>
    %689 = arith.mulf %688, %560 : vector<1x256xf32>
    %690 = arith.addf %686, %689 : vector<1x256xf32>
    %c26_144 = arith.constant 26 : index
    %691 = memref.load %arg1[%c26_144] : memref<48xf32, #tpu.memory_space<smem>>
    %692 = vector.broadcast %691 : f32 to vector<1x256xf32>
    %693 = arith.addf %690, %692 : vector<1x256xf32>
    %cst_145 = arith.constant 0.000000e+00 : f32
    %694 = vector.broadcast %cst_145 : f32 to vector<1x256xf32>
    %695 = arith.maximumf %693, %694 : vector<1x256xf32>
    %c27_146 = arith.constant 27 : index
    %696 = memref.load %arg1[%c27_146] : memref<48xf32, #tpu.memory_space<smem>>
    %697 = vector.broadcast %696 : f32 to vector<1x256xf32>
    %698 = arith.addf %695, %697 : vector<1x256xf32>
    %c56_147 = arith.constant 56 : index
    %699 = memref.load %arg0[%c56_147] : memref<96xf32, #tpu.memory_space<smem>>
    %700 = vector.broadcast %699 : f32 to vector<1x256xf32>
    %701 = arith.mulf %700, %491 : vector<1x256xf32>
    %c57_148 = arith.constant 57 : index
    %702 = memref.load %arg0[%c57_148] : memref<96xf32, #tpu.memory_space<smem>>
    %703 = vector.broadcast %702 : f32 to vector<1x256xf32>
    %704 = arith.mulf %703, %514 : vector<1x256xf32>
    %705 = arith.addf %701, %704 : vector<1x256xf32>
    %c58_149 = arith.constant 58 : index
    %706 = memref.load %arg0[%c58_149] : memref<96xf32, #tpu.memory_space<smem>>
    %707 = vector.broadcast %706 : f32 to vector<1x256xf32>
    %708 = arith.mulf %707, %537 : vector<1x256xf32>
    %709 = arith.addf %705, %708 : vector<1x256xf32>
    %c59_150 = arith.constant 59 : index
    %710 = memref.load %arg0[%c59_150] : memref<96xf32, #tpu.memory_space<smem>>
    %711 = vector.broadcast %710 : f32 to vector<1x256xf32>
    %712 = arith.mulf %711, %560 : vector<1x256xf32>
    %713 = arith.addf %709, %712 : vector<1x256xf32>
    %c28_151 = arith.constant 28 : index
    %714 = memref.load %arg1[%c28_151] : memref<48xf32, #tpu.memory_space<smem>>
    %715 = vector.broadcast %714 : f32 to vector<1x256xf32>
    %716 = arith.addf %713, %715 : vector<1x256xf32>
    %cst_152 = arith.constant 0.000000e+00 : f32
    %717 = vector.broadcast %cst_152 : f32 to vector<1x256xf32>
    %718 = arith.maximumf %716, %717 : vector<1x256xf32>
    %c29_153 = arith.constant 29 : index
    %719 = memref.load %arg1[%c29_153] : memref<48xf32, #tpu.memory_space<smem>>
    %720 = vector.broadcast %719 : f32 to vector<1x256xf32>
    %721 = arith.addf %718, %720 : vector<1x256xf32>
    %c60_154 = arith.constant 60 : index
    %722 = memref.load %arg0[%c60_154] : memref<96xf32, #tpu.memory_space<smem>>
    %723 = vector.broadcast %722 : f32 to vector<1x256xf32>
    %724 = arith.mulf %723, %491 : vector<1x256xf32>
    %c61_155 = arith.constant 61 : index
    %725 = memref.load %arg0[%c61_155] : memref<96xf32, #tpu.memory_space<smem>>
    %726 = vector.broadcast %725 : f32 to vector<1x256xf32>
    %727 = arith.mulf %726, %514 : vector<1x256xf32>
    %728 = arith.addf %724, %727 : vector<1x256xf32>
    %c62_156 = arith.constant 62 : index
    %729 = memref.load %arg0[%c62_156] : memref<96xf32, #tpu.memory_space<smem>>
    %730 = vector.broadcast %729 : f32 to vector<1x256xf32>
    %731 = arith.mulf %730, %537 : vector<1x256xf32>
    %732 = arith.addf %728, %731 : vector<1x256xf32>
    %c63_157 = arith.constant 63 : index
    %733 = memref.load %arg0[%c63_157] : memref<96xf32, #tpu.memory_space<smem>>
    %734 = vector.broadcast %733 : f32 to vector<1x256xf32>
    %735 = arith.mulf %734, %560 : vector<1x256xf32>
    %736 = arith.addf %732, %735 : vector<1x256xf32>
    %c30_158 = arith.constant 30 : index
    %737 = memref.load %arg1[%c30_158] : memref<48xf32, #tpu.memory_space<smem>>
    %738 = vector.broadcast %737 : f32 to vector<1x256xf32>
    %739 = arith.addf %736, %738 : vector<1x256xf32>
    %cst_159 = arith.constant 0.000000e+00 : f32
    %740 = vector.broadcast %cst_159 : f32 to vector<1x256xf32>
    %741 = arith.maximumf %739, %740 : vector<1x256xf32>
    %c31_160 = arith.constant 31 : index
    %742 = memref.load %arg1[%c31_160] : memref<48xf32, #tpu.memory_space<smem>>
    %743 = vector.broadcast %742 : f32 to vector<1x256xf32>
    %744 = arith.addf %741, %743 : vector<1x256xf32>
    %745 = arith.addf %583, %399 : vector<1x256xf32>
    %746 = arith.addf %606, %422 : vector<1x256xf32>
    %747 = arith.addf %629, %445 : vector<1x256xf32>
    %748 = arith.addf %652, %468 : vector<1x256xf32>
    %749 = arith.addf %675, %491 : vector<1x256xf32>
    %750 = arith.addf %698, %514 : vector<1x256xf32>
    %751 = arith.addf %721, %537 : vector<1x256xf32>
    %752 = arith.addf %744, %560 : vector<1x256xf32>
    %c64 = arith.constant 64 : index
    %753 = memref.load %arg0[%c64] : memref<96xf32, #tpu.memory_space<smem>>
    %754 = vector.broadcast %753 : f32 to vector<1x256xf32>
    %755 = arith.mulf %754, %745 : vector<1x256xf32>
    %c65 = arith.constant 65 : index
    %756 = memref.load %arg0[%c65] : memref<96xf32, #tpu.memory_space<smem>>
    %757 = vector.broadcast %756 : f32 to vector<1x256xf32>
    %758 = arith.mulf %757, %746 : vector<1x256xf32>
    %759 = arith.addf %755, %758 : vector<1x256xf32>
    %c66 = arith.constant 66 : index
    %760 = memref.load %arg0[%c66] : memref<96xf32, #tpu.memory_space<smem>>
    %761 = vector.broadcast %760 : f32 to vector<1x256xf32>
    %762 = arith.mulf %761, %747 : vector<1x256xf32>
    %763 = arith.addf %759, %762 : vector<1x256xf32>
    %c67 = arith.constant 67 : index
    %764 = memref.load %arg0[%c67] : memref<96xf32, #tpu.memory_space<smem>>
    %765 = vector.broadcast %764 : f32 to vector<1x256xf32>
    %766 = arith.mulf %765, %748 : vector<1x256xf32>
    %767 = arith.addf %763, %766 : vector<1x256xf32>
    %c32_161 = arith.constant 32 : index
    %768 = memref.load %arg1[%c32_161] : memref<48xf32, #tpu.memory_space<smem>>
    %769 = vector.broadcast %768 : f32 to vector<1x256xf32>
    %770 = arith.addf %767, %769 : vector<1x256xf32>
    %cst_162 = arith.constant 0.000000e+00 : f32
    %771 = vector.broadcast %cst_162 : f32 to vector<1x256xf32>
    %772 = arith.maximumf %770, %771 : vector<1x256xf32>
    %c33_163 = arith.constant 33 : index
    %773 = memref.load %arg1[%c33_163] : memref<48xf32, #tpu.memory_space<smem>>
    %774 = vector.broadcast %773 : f32 to vector<1x256xf32>
    %775 = arith.addf %772, %774 : vector<1x256xf32>
    %c68 = arith.constant 68 : index
    %776 = memref.load %arg0[%c68] : memref<96xf32, #tpu.memory_space<smem>>
    %777 = vector.broadcast %776 : f32 to vector<1x256xf32>
    %778 = arith.mulf %777, %745 : vector<1x256xf32>
    %c69 = arith.constant 69 : index
    %779 = memref.load %arg0[%c69] : memref<96xf32, #tpu.memory_space<smem>>
    %780 = vector.broadcast %779 : f32 to vector<1x256xf32>
    %781 = arith.mulf %780, %746 : vector<1x256xf32>
    %782 = arith.addf %778, %781 : vector<1x256xf32>
    %c70 = arith.constant 70 : index
    %783 = memref.load %arg0[%c70] : memref<96xf32, #tpu.memory_space<smem>>
    %784 = vector.broadcast %783 : f32 to vector<1x256xf32>
    %785 = arith.mulf %784, %747 : vector<1x256xf32>
    %786 = arith.addf %782, %785 : vector<1x256xf32>
    %c71 = arith.constant 71 : index
    %787 = memref.load %arg0[%c71] : memref<96xf32, #tpu.memory_space<smem>>
    %788 = vector.broadcast %787 : f32 to vector<1x256xf32>
    %789 = arith.mulf %788, %748 : vector<1x256xf32>
    %790 = arith.addf %786, %789 : vector<1x256xf32>
    %c34_164 = arith.constant 34 : index
    %791 = memref.load %arg1[%c34_164] : memref<48xf32, #tpu.memory_space<smem>>
    %792 = vector.broadcast %791 : f32 to vector<1x256xf32>
    %793 = arith.addf %790, %792 : vector<1x256xf32>
    %cst_165 = arith.constant 0.000000e+00 : f32
    %794 = vector.broadcast %cst_165 : f32 to vector<1x256xf32>
    %795 = arith.maximumf %793, %794 : vector<1x256xf32>
    %c35_166 = arith.constant 35 : index
    %796 = memref.load %arg1[%c35_166] : memref<48xf32, #tpu.memory_space<smem>>
    %797 = vector.broadcast %796 : f32 to vector<1x256xf32>
    %798 = arith.addf %795, %797 : vector<1x256xf32>
    %c72 = arith.constant 72 : index
    %799 = memref.load %arg0[%c72] : memref<96xf32, #tpu.memory_space<smem>>
    %800 = vector.broadcast %799 : f32 to vector<1x256xf32>
    %801 = arith.mulf %800, %745 : vector<1x256xf32>
    %c73 = arith.constant 73 : index
    %802 = memref.load %arg0[%c73] : memref<96xf32, #tpu.memory_space<smem>>
    %803 = vector.broadcast %802 : f32 to vector<1x256xf32>
    %804 = arith.mulf %803, %746 : vector<1x256xf32>
    %805 = arith.addf %801, %804 : vector<1x256xf32>
    %c74 = arith.constant 74 : index
    %806 = memref.load %arg0[%c74] : memref<96xf32, #tpu.memory_space<smem>>
    %807 = vector.broadcast %806 : f32 to vector<1x256xf32>
    %808 = arith.mulf %807, %747 : vector<1x256xf32>
    %809 = arith.addf %805, %808 : vector<1x256xf32>
    %c75 = arith.constant 75 : index
    %810 = memref.load %arg0[%c75] : memref<96xf32, #tpu.memory_space<smem>>
    %811 = vector.broadcast %810 : f32 to vector<1x256xf32>
    %812 = arith.mulf %811, %748 : vector<1x256xf32>
    %813 = arith.addf %809, %812 : vector<1x256xf32>
    %c36_167 = arith.constant 36 : index
    %814 = memref.load %arg1[%c36_167] : memref<48xf32, #tpu.memory_space<smem>>
    %815 = vector.broadcast %814 : f32 to vector<1x256xf32>
    %816 = arith.addf %813, %815 : vector<1x256xf32>
    %cst_168 = arith.constant 0.000000e+00 : f32
    %817 = vector.broadcast %cst_168 : f32 to vector<1x256xf32>
    %818 = arith.maximumf %816, %817 : vector<1x256xf32>
    %c37_169 = arith.constant 37 : index
    %819 = memref.load %arg1[%c37_169] : memref<48xf32, #tpu.memory_space<smem>>
    %820 = vector.broadcast %819 : f32 to vector<1x256xf32>
    %821 = arith.addf %818, %820 : vector<1x256xf32>
    %c76 = arith.constant 76 : index
    %822 = memref.load %arg0[%c76] : memref<96xf32, #tpu.memory_space<smem>>
    %823 = vector.broadcast %822 : f32 to vector<1x256xf32>
    %824 = arith.mulf %823, %745 : vector<1x256xf32>
    %c77 = arith.constant 77 : index
    %825 = memref.load %arg0[%c77] : memref<96xf32, #tpu.memory_space<smem>>
    %826 = vector.broadcast %825 : f32 to vector<1x256xf32>
    %827 = arith.mulf %826, %746 : vector<1x256xf32>
    %828 = arith.addf %824, %827 : vector<1x256xf32>
    %c78 = arith.constant 78 : index
    %829 = memref.load %arg0[%c78] : memref<96xf32, #tpu.memory_space<smem>>
    %830 = vector.broadcast %829 : f32 to vector<1x256xf32>
    %831 = arith.mulf %830, %747 : vector<1x256xf32>
    %832 = arith.addf %828, %831 : vector<1x256xf32>
    %c79 = arith.constant 79 : index
    %833 = memref.load %arg0[%c79] : memref<96xf32, #tpu.memory_space<smem>>
    %834 = vector.broadcast %833 : f32 to vector<1x256xf32>
    %835 = arith.mulf %834, %748 : vector<1x256xf32>
    %836 = arith.addf %832, %835 : vector<1x256xf32>
    %c38_170 = arith.constant 38 : index
    %837 = memref.load %arg1[%c38_170] : memref<48xf32, #tpu.memory_space<smem>>
    %838 = vector.broadcast %837 : f32 to vector<1x256xf32>
    %839 = arith.addf %836, %838 : vector<1x256xf32>
    %cst_171 = arith.constant 0.000000e+00 : f32
    %840 = vector.broadcast %cst_171 : f32 to vector<1x256xf32>
    %841 = arith.maximumf %839, %840 : vector<1x256xf32>
    %c39_172 = arith.constant 39 : index
    %842 = memref.load %arg1[%c39_172] : memref<48xf32, #tpu.memory_space<smem>>
    %843 = vector.broadcast %842 : f32 to vector<1x256xf32>
    %844 = arith.addf %841, %843 : vector<1x256xf32>
    %c64_173 = arith.constant 64 : index
    %845 = memref.load %arg0[%c64_173] : memref<96xf32, #tpu.memory_space<smem>>
    %846 = vector.broadcast %845 : f32 to vector<1x256xf32>
    %847 = arith.mulf %846, %749 : vector<1x256xf32>
    %c65_174 = arith.constant 65 : index
    %848 = memref.load %arg0[%c65_174] : memref<96xf32, #tpu.memory_space<smem>>
    %849 = vector.broadcast %848 : f32 to vector<1x256xf32>
    %850 = arith.mulf %849, %750 : vector<1x256xf32>
    %851 = arith.addf %847, %850 : vector<1x256xf32>
    %c66_175 = arith.constant 66 : index
    %852 = memref.load %arg0[%c66_175] : memref<96xf32, #tpu.memory_space<smem>>
    %853 = vector.broadcast %852 : f32 to vector<1x256xf32>
    %854 = arith.mulf %853, %751 : vector<1x256xf32>
    %855 = arith.addf %851, %854 : vector<1x256xf32>
    %c67_176 = arith.constant 67 : index
    %856 = memref.load %arg0[%c67_176] : memref<96xf32, #tpu.memory_space<smem>>
    %857 = vector.broadcast %856 : f32 to vector<1x256xf32>
    %858 = arith.mulf %857, %752 : vector<1x256xf32>
    %859 = arith.addf %855, %858 : vector<1x256xf32>
    %c32_177 = arith.constant 32 : index
    %860 = memref.load %arg1[%c32_177] : memref<48xf32, #tpu.memory_space<smem>>
    %861 = vector.broadcast %860 : f32 to vector<1x256xf32>
    %862 = arith.addf %859, %861 : vector<1x256xf32>
    %cst_178 = arith.constant 0.000000e+00 : f32
    %863 = vector.broadcast %cst_178 : f32 to vector<1x256xf32>
    %864 = arith.maximumf %862, %863 : vector<1x256xf32>
    %c33_179 = arith.constant 33 : index
    %865 = memref.load %arg1[%c33_179] : memref<48xf32, #tpu.memory_space<smem>>
    %866 = vector.broadcast %865 : f32 to vector<1x256xf32>
    %867 = arith.addf %864, %866 : vector<1x256xf32>
    %c68_180 = arith.constant 68 : index
    %868 = memref.load %arg0[%c68_180] : memref<96xf32, #tpu.memory_space<smem>>
    %869 = vector.broadcast %868 : f32 to vector<1x256xf32>
    %870 = arith.mulf %869, %749 : vector<1x256xf32>
    %c69_181 = arith.constant 69 : index
    %871 = memref.load %arg0[%c69_181] : memref<96xf32, #tpu.memory_space<smem>>
    %872 = vector.broadcast %871 : f32 to vector<1x256xf32>
    %873 = arith.mulf %872, %750 : vector<1x256xf32>
    %874 = arith.addf %870, %873 : vector<1x256xf32>
    %c70_182 = arith.constant 70 : index
    %875 = memref.load %arg0[%c70_182] : memref<96xf32, #tpu.memory_space<smem>>
    %876 = vector.broadcast %875 : f32 to vector<1x256xf32>
    %877 = arith.mulf %876, %751 : vector<1x256xf32>
    %878 = arith.addf %874, %877 : vector<1x256xf32>
    %c71_183 = arith.constant 71 : index
    %879 = memref.load %arg0[%c71_183] : memref<96xf32, #tpu.memory_space<smem>>
    %880 = vector.broadcast %879 : f32 to vector<1x256xf32>
    %881 = arith.mulf %880, %752 : vector<1x256xf32>
    %882 = arith.addf %878, %881 : vector<1x256xf32>
    %c34_184 = arith.constant 34 : index
    %883 = memref.load %arg1[%c34_184] : memref<48xf32, #tpu.memory_space<smem>>
    %884 = vector.broadcast %883 : f32 to vector<1x256xf32>
    %885 = arith.addf %882, %884 : vector<1x256xf32>
    %cst_185 = arith.constant 0.000000e+00 : f32
    %886 = vector.broadcast %cst_185 : f32 to vector<1x256xf32>
    %887 = arith.maximumf %885, %886 : vector<1x256xf32>
    %c35_186 = arith.constant 35 : index
    %888 = memref.load %arg1[%c35_186] : memref<48xf32, #tpu.memory_space<smem>>
    %889 = vector.broadcast %888 : f32 to vector<1x256xf32>
    %890 = arith.addf %887, %889 : vector<1x256xf32>
    %c72_187 = arith.constant 72 : index
    %891 = memref.load %arg0[%c72_187] : memref<96xf32, #tpu.memory_space<smem>>
    %892 = vector.broadcast %891 : f32 to vector<1x256xf32>
    %893 = arith.mulf %892, %749 : vector<1x256xf32>
    %c73_188 = arith.constant 73 : index
    %894 = memref.load %arg0[%c73_188] : memref<96xf32, #tpu.memory_space<smem>>
    %895 = vector.broadcast %894 : f32 to vector<1x256xf32>
    %896 = arith.mulf %895, %750 : vector<1x256xf32>
    %897 = arith.addf %893, %896 : vector<1x256xf32>
    %c74_189 = arith.constant 74 : index
    %898 = memref.load %arg0[%c74_189] : memref<96xf32, #tpu.memory_space<smem>>
    %899 = vector.broadcast %898 : f32 to vector<1x256xf32>
    %900 = arith.mulf %899, %751 : vector<1x256xf32>
    %901 = arith.addf %897, %900 : vector<1x256xf32>
    %c75_190 = arith.constant 75 : index
    %902 = memref.load %arg0[%c75_190] : memref<96xf32, #tpu.memory_space<smem>>
    %903 = vector.broadcast %902 : f32 to vector<1x256xf32>
    %904 = arith.mulf %903, %752 : vector<1x256xf32>
    %905 = arith.addf %901, %904 : vector<1x256xf32>
    %c36_191 = arith.constant 36 : index
    %906 = memref.load %arg1[%c36_191] : memref<48xf32, #tpu.memory_space<smem>>
    %907 = vector.broadcast %906 : f32 to vector<1x256xf32>
    %908 = arith.addf %905, %907 : vector<1x256xf32>
    %cst_192 = arith.constant 0.000000e+00 : f32
    %909 = vector.broadcast %cst_192 : f32 to vector<1x256xf32>
    %910 = arith.maximumf %908, %909 : vector<1x256xf32>
    %c37_193 = arith.constant 37 : index
    %911 = memref.load %arg1[%c37_193] : memref<48xf32, #tpu.memory_space<smem>>
    %912 = vector.broadcast %911 : f32 to vector<1x256xf32>
    %913 = arith.addf %910, %912 : vector<1x256xf32>
    %c76_194 = arith.constant 76 : index
    %914 = memref.load %arg0[%c76_194] : memref<96xf32, #tpu.memory_space<smem>>
    %915 = vector.broadcast %914 : f32 to vector<1x256xf32>
    %916 = arith.mulf %915, %749 : vector<1x256xf32>
    %c77_195 = arith.constant 77 : index
    %917 = memref.load %arg0[%c77_195] : memref<96xf32, #tpu.memory_space<smem>>
    %918 = vector.broadcast %917 : f32 to vector<1x256xf32>
    %919 = arith.mulf %918, %750 : vector<1x256xf32>
    %920 = arith.addf %916, %919 : vector<1x256xf32>
    %c78_196 = arith.constant 78 : index
    %921 = memref.load %arg0[%c78_196] : memref<96xf32, #tpu.memory_space<smem>>
    %922 = vector.broadcast %921 : f32 to vector<1x256xf32>
    %923 = arith.mulf %922, %751 : vector<1x256xf32>
    %924 = arith.addf %920, %923 : vector<1x256xf32>
    %c79_197 = arith.constant 79 : index
    %925 = memref.load %arg0[%c79_197] : memref<96xf32, #tpu.memory_space<smem>>
    %926 = vector.broadcast %925 : f32 to vector<1x256xf32>
    %927 = arith.mulf %926, %752 : vector<1x256xf32>
    %928 = arith.addf %924, %927 : vector<1x256xf32>
    %c38_198 = arith.constant 38 : index
    %929 = memref.load %arg1[%c38_198] : memref<48xf32, #tpu.memory_space<smem>>
    %930 = vector.broadcast %929 : f32 to vector<1x256xf32>
    %931 = arith.addf %928, %930 : vector<1x256xf32>
    %cst_199 = arith.constant 0.000000e+00 : f32
    %932 = vector.broadcast %cst_199 : f32 to vector<1x256xf32>
    %933 = arith.maximumf %931, %932 : vector<1x256xf32>
    %c39_200 = arith.constant 39 : index
    %934 = memref.load %arg1[%c39_200] : memref<48xf32, #tpu.memory_space<smem>>
    %935 = vector.broadcast %934 : f32 to vector<1x256xf32>
    %936 = arith.addf %933, %935 : vector<1x256xf32>
    %937 = arith.addf %775, %215 : vector<1x256xf32>
    %938 = arith.addf %798, %238 : vector<1x256xf32>
    %939 = arith.addf %821, %261 : vector<1x256xf32>
    %940 = arith.addf %844, %284 : vector<1x256xf32>
    %941 = arith.addf %867, %307 : vector<1x256xf32>
    %942 = arith.addf %890, %330 : vector<1x256xf32>
    %943 = arith.addf %913, %353 : vector<1x256xf32>
    %944 = arith.addf %936, %376 : vector<1x256xf32>
    %c80 = arith.constant 80 : index
    %945 = memref.load %arg0[%c80] : memref<96xf32, #tpu.memory_space<smem>>
    %946 = vector.broadcast %945 : f32 to vector<1x256xf32>
    %947 = arith.mulf %946, %937 : vector<1x256xf32>
    %c81 = arith.constant 81 : index
    %948 = memref.load %arg0[%c81] : memref<96xf32, #tpu.memory_space<smem>>
    %949 = vector.broadcast %948 : f32 to vector<1x256xf32>
    %950 = arith.mulf %949, %938 : vector<1x256xf32>
    %951 = arith.addf %947, %950 : vector<1x256xf32>
    %c82 = arith.constant 82 : index
    %952 = memref.load %arg0[%c82] : memref<96xf32, #tpu.memory_space<smem>>
    %953 = vector.broadcast %952 : f32 to vector<1x256xf32>
    %954 = arith.mulf %953, %939 : vector<1x256xf32>
    %955 = arith.addf %951, %954 : vector<1x256xf32>
    %c83 = arith.constant 83 : index
    %956 = memref.load %arg0[%c83] : memref<96xf32, #tpu.memory_space<smem>>
    %957 = vector.broadcast %956 : f32 to vector<1x256xf32>
    %958 = arith.mulf %957, %940 : vector<1x256xf32>
    %959 = arith.addf %955, %958 : vector<1x256xf32>
    %c40_201 = arith.constant 40 : index
    %960 = memref.load %arg1[%c40_201] : memref<48xf32, #tpu.memory_space<smem>>
    %961 = vector.broadcast %960 : f32 to vector<1x256xf32>
    %962 = arith.addf %959, %961 : vector<1x256xf32>
    %cst_202 = arith.constant 0.000000e+00 : f32
    %963 = vector.broadcast %cst_202 : f32 to vector<1x256xf32>
    %964 = arith.maximumf %962, %963 : vector<1x256xf32>
    %c41_203 = arith.constant 41 : index
    %965 = memref.load %arg1[%c41_203] : memref<48xf32, #tpu.memory_space<smem>>
    %966 = vector.broadcast %965 : f32 to vector<1x256xf32>
    %967 = arith.addf %964, %966 : vector<1x256xf32>
    %c84 = arith.constant 84 : index
    %968 = memref.load %arg0[%c84] : memref<96xf32, #tpu.memory_space<smem>>
    %969 = vector.broadcast %968 : f32 to vector<1x256xf32>
    %970 = arith.mulf %969, %937 : vector<1x256xf32>
    %c85 = arith.constant 85 : index
    %971 = memref.load %arg0[%c85] : memref<96xf32, #tpu.memory_space<smem>>
    %972 = vector.broadcast %971 : f32 to vector<1x256xf32>
    %973 = arith.mulf %972, %938 : vector<1x256xf32>
    %974 = arith.addf %970, %973 : vector<1x256xf32>
    %c86 = arith.constant 86 : index
    %975 = memref.load %arg0[%c86] : memref<96xf32, #tpu.memory_space<smem>>
    %976 = vector.broadcast %975 : f32 to vector<1x256xf32>
    %977 = arith.mulf %976, %939 : vector<1x256xf32>
    %978 = arith.addf %974, %977 : vector<1x256xf32>
    %c87 = arith.constant 87 : index
    %979 = memref.load %arg0[%c87] : memref<96xf32, #tpu.memory_space<smem>>
    %980 = vector.broadcast %979 : f32 to vector<1x256xf32>
    %981 = arith.mulf %980, %940 : vector<1x256xf32>
    %982 = arith.addf %978, %981 : vector<1x256xf32>
    %c42_204 = arith.constant 42 : index
    %983 = memref.load %arg1[%c42_204] : memref<48xf32, #tpu.memory_space<smem>>
    %984 = vector.broadcast %983 : f32 to vector<1x256xf32>
    %985 = arith.addf %982, %984 : vector<1x256xf32>
    %cst_205 = arith.constant 0.000000e+00 : f32
    %986 = vector.broadcast %cst_205 : f32 to vector<1x256xf32>
    %987 = arith.maximumf %985, %986 : vector<1x256xf32>
    %c43_206 = arith.constant 43 : index
    %988 = memref.load %arg1[%c43_206] : memref<48xf32, #tpu.memory_space<smem>>
    %989 = vector.broadcast %988 : f32 to vector<1x256xf32>
    %990 = arith.addf %987, %989 : vector<1x256xf32>
    %c88 = arith.constant 88 : index
    %991 = memref.load %arg0[%c88] : memref<96xf32, #tpu.memory_space<smem>>
    %992 = vector.broadcast %991 : f32 to vector<1x256xf32>
    %993 = arith.mulf %992, %937 : vector<1x256xf32>
    %c89 = arith.constant 89 : index
    %994 = memref.load %arg0[%c89] : memref<96xf32, #tpu.memory_space<smem>>
    %995 = vector.broadcast %994 : f32 to vector<1x256xf32>
    %996 = arith.mulf %995, %938 : vector<1x256xf32>
    %997 = arith.addf %993, %996 : vector<1x256xf32>
    %c90 = arith.constant 90 : index
    %998 = memref.load %arg0[%c90] : memref<96xf32, #tpu.memory_space<smem>>
    %999 = vector.broadcast %998 : f32 to vector<1x256xf32>
    %1000 = arith.mulf %999, %939 : vector<1x256xf32>
    %1001 = arith.addf %997, %1000 : vector<1x256xf32>
    %c91 = arith.constant 91 : index
    %1002 = memref.load %arg0[%c91] : memref<96xf32, #tpu.memory_space<smem>>
    %1003 = vector.broadcast %1002 : f32 to vector<1x256xf32>
    %1004 = arith.mulf %1003, %940 : vector<1x256xf32>
    %1005 = arith.addf %1001, %1004 : vector<1x256xf32>
    %c44_207 = arith.constant 44 : index
    %1006 = memref.load %arg1[%c44_207] : memref<48xf32, #tpu.memory_space<smem>>
    %1007 = vector.broadcast %1006 : f32 to vector<1x256xf32>
    %1008 = arith.addf %1005, %1007 : vector<1x256xf32>
    %cst_208 = arith.constant 0.000000e+00 : f32
    %1009 = vector.broadcast %cst_208 : f32 to vector<1x256xf32>
    %1010 = arith.maximumf %1008, %1009 : vector<1x256xf32>
    %c45_209 = arith.constant 45 : index
    %1011 = memref.load %arg1[%c45_209] : memref<48xf32, #tpu.memory_space<smem>>
    %1012 = vector.broadcast %1011 : f32 to vector<1x256xf32>
    %1013 = arith.addf %1010, %1012 : vector<1x256xf32>
    %c92 = arith.constant 92 : index
    %1014 = memref.load %arg0[%c92] : memref<96xf32, #tpu.memory_space<smem>>
    %1015 = vector.broadcast %1014 : f32 to vector<1x256xf32>
    %1016 = arith.mulf %1015, %937 : vector<1x256xf32>
    %c93 = arith.constant 93 : index
    %1017 = memref.load %arg0[%c93] : memref<96xf32, #tpu.memory_space<smem>>
    %1018 = vector.broadcast %1017 : f32 to vector<1x256xf32>
    %1019 = arith.mulf %1018, %938 : vector<1x256xf32>
    %1020 = arith.addf %1016, %1019 : vector<1x256xf32>
    %c94 = arith.constant 94 : index
    %1021 = memref.load %arg0[%c94] : memref<96xf32, #tpu.memory_space<smem>>
    %1022 = vector.broadcast %1021 : f32 to vector<1x256xf32>
    %1023 = arith.mulf %1022, %939 : vector<1x256xf32>
    %1024 = arith.addf %1020, %1023 : vector<1x256xf32>
    %c95 = arith.constant 95 : index
    %1025 = memref.load %arg0[%c95] : memref<96xf32, #tpu.memory_space<smem>>
    %1026 = vector.broadcast %1025 : f32 to vector<1x256xf32>
    %1027 = arith.mulf %1026, %940 : vector<1x256xf32>
    %1028 = arith.addf %1024, %1027 : vector<1x256xf32>
    %c46_210 = arith.constant 46 : index
    %1029 = memref.load %arg1[%c46_210] : memref<48xf32, #tpu.memory_space<smem>>
    %1030 = vector.broadcast %1029 : f32 to vector<1x256xf32>
    %1031 = arith.addf %1028, %1030 : vector<1x256xf32>
    %cst_211 = arith.constant 0.000000e+00 : f32
    %1032 = vector.broadcast %cst_211 : f32 to vector<1x256xf32>
    %1033 = arith.maximumf %1031, %1032 : vector<1x256xf32>
    %c47_212 = arith.constant 47 : index
    %1034 = memref.load %arg1[%c47_212] : memref<48xf32, #tpu.memory_space<smem>>
    %1035 = vector.broadcast %1034 : f32 to vector<1x256xf32>
    %1036 = arith.addf %1033, %1035 : vector<1x256xf32>
    %c80_213 = arith.constant 80 : index
    %1037 = memref.load %arg0[%c80_213] : memref<96xf32, #tpu.memory_space<smem>>
    %1038 = vector.broadcast %1037 : f32 to vector<1x256xf32>
    %1039 = arith.mulf %1038, %941 : vector<1x256xf32>
    %c81_214 = arith.constant 81 : index
    %1040 = memref.load %arg0[%c81_214] : memref<96xf32, #tpu.memory_space<smem>>
    %1041 = vector.broadcast %1040 : f32 to vector<1x256xf32>
    %1042 = arith.mulf %1041, %942 : vector<1x256xf32>
    %1043 = arith.addf %1039, %1042 : vector<1x256xf32>
    %c82_215 = arith.constant 82 : index
    %1044 = memref.load %arg0[%c82_215] : memref<96xf32, #tpu.memory_space<smem>>
    %1045 = vector.broadcast %1044 : f32 to vector<1x256xf32>
    %1046 = arith.mulf %1045, %943 : vector<1x256xf32>
    %1047 = arith.addf %1043, %1046 : vector<1x256xf32>
    %c83_216 = arith.constant 83 : index
    %1048 = memref.load %arg0[%c83_216] : memref<96xf32, #tpu.memory_space<smem>>
    %1049 = vector.broadcast %1048 : f32 to vector<1x256xf32>
    %1050 = arith.mulf %1049, %944 : vector<1x256xf32>
    %1051 = arith.addf %1047, %1050 : vector<1x256xf32>
    %c40_217 = arith.constant 40 : index
    %1052 = memref.load %arg1[%c40_217] : memref<48xf32, #tpu.memory_space<smem>>
    %1053 = vector.broadcast %1052 : f32 to vector<1x256xf32>
    %1054 = arith.addf %1051, %1053 : vector<1x256xf32>
    %cst_218 = arith.constant 0.000000e+00 : f32
    %1055 = vector.broadcast %cst_218 : f32 to vector<1x256xf32>
    %1056 = arith.maximumf %1054, %1055 : vector<1x256xf32>
    %c41_219 = arith.constant 41 : index
    %1057 = memref.load %arg1[%c41_219] : memref<48xf32, #tpu.memory_space<smem>>
    %1058 = vector.broadcast %1057 : f32 to vector<1x256xf32>
    %1059 = arith.addf %1056, %1058 : vector<1x256xf32>
    %c84_220 = arith.constant 84 : index
    %1060 = memref.load %arg0[%c84_220] : memref<96xf32, #tpu.memory_space<smem>>
    %1061 = vector.broadcast %1060 : f32 to vector<1x256xf32>
    %1062 = arith.mulf %1061, %941 : vector<1x256xf32>
    %c85_221 = arith.constant 85 : index
    %1063 = memref.load %arg0[%c85_221] : memref<96xf32, #tpu.memory_space<smem>>
    %1064 = vector.broadcast %1063 : f32 to vector<1x256xf32>
    %1065 = arith.mulf %1064, %942 : vector<1x256xf32>
    %1066 = arith.addf %1062, %1065 : vector<1x256xf32>
    %c86_222 = arith.constant 86 : index
    %1067 = memref.load %arg0[%c86_222] : memref<96xf32, #tpu.memory_space<smem>>
    %1068 = vector.broadcast %1067 : f32 to vector<1x256xf32>
    %1069 = arith.mulf %1068, %943 : vector<1x256xf32>
    %1070 = arith.addf %1066, %1069 : vector<1x256xf32>
    %c87_223 = arith.constant 87 : index
    %1071 = memref.load %arg0[%c87_223] : memref<96xf32, #tpu.memory_space<smem>>
    %1072 = vector.broadcast %1071 : f32 to vector<1x256xf32>
    %1073 = arith.mulf %1072, %944 : vector<1x256xf32>
    %1074 = arith.addf %1070, %1073 : vector<1x256xf32>
    %c42_224 = arith.constant 42 : index
    %1075 = memref.load %arg1[%c42_224] : memref<48xf32, #tpu.memory_space<smem>>
    %1076 = vector.broadcast %1075 : f32 to vector<1x256xf32>
    %1077 = arith.addf %1074, %1076 : vector<1x256xf32>
    %cst_225 = arith.constant 0.000000e+00 : f32
    %1078 = vector.broadcast %cst_225 : f32 to vector<1x256xf32>
    %1079 = arith.maximumf %1077, %1078 : vector<1x256xf32>
    %c43_226 = arith.constant 43 : index
    %1080 = memref.load %arg1[%c43_226] : memref<48xf32, #tpu.memory_space<smem>>
    %1081 = vector.broadcast %1080 : f32 to vector<1x256xf32>
    %1082 = arith.addf %1079, %1081 : vector<1x256xf32>
    %c88_227 = arith.constant 88 : index
    %1083 = memref.load %arg0[%c88_227] : memref<96xf32, #tpu.memory_space<smem>>
    %1084 = vector.broadcast %1083 : f32 to vector<1x256xf32>
    %1085 = arith.mulf %1084, %941 : vector<1x256xf32>
    %c89_228 = arith.constant 89 : index
    %1086 = memref.load %arg0[%c89_228] : memref<96xf32, #tpu.memory_space<smem>>
    %1087 = vector.broadcast %1086 : f32 to vector<1x256xf32>
    %1088 = arith.mulf %1087, %942 : vector<1x256xf32>
    %1089 = arith.addf %1085, %1088 : vector<1x256xf32>
    %c90_229 = arith.constant 90 : index
    %1090 = memref.load %arg0[%c90_229] : memref<96xf32, #tpu.memory_space<smem>>
    %1091 = vector.broadcast %1090 : f32 to vector<1x256xf32>
    %1092 = arith.mulf %1091, %943 : vector<1x256xf32>
    %1093 = arith.addf %1089, %1092 : vector<1x256xf32>
    %c91_230 = arith.constant 91 : index
    %1094 = memref.load %arg0[%c91_230] : memref<96xf32, #tpu.memory_space<smem>>
    %1095 = vector.broadcast %1094 : f32 to vector<1x256xf32>
    %1096 = arith.mulf %1095, %944 : vector<1x256xf32>
    %1097 = arith.addf %1093, %1096 : vector<1x256xf32>
    %c44_231 = arith.constant 44 : index
    %1098 = memref.load %arg1[%c44_231] : memref<48xf32, #tpu.memory_space<smem>>
    %1099 = vector.broadcast %1098 : f32 to vector<1x256xf32>
    %1100 = arith.addf %1097, %1099 : vector<1x256xf32>
    %cst_232 = arith.constant 0.000000e+00 : f32
    %1101 = vector.broadcast %cst_232 : f32 to vector<1x256xf32>
    %1102 = arith.maximumf %1100, %1101 : vector<1x256xf32>
    %c45_233 = arith.constant 45 : index
    %1103 = memref.load %arg1[%c45_233] : memref<48xf32, #tpu.memory_space<smem>>
    %1104 = vector.broadcast %1103 : f32 to vector<1x256xf32>
    %1105 = arith.addf %1102, %1104 : vector<1x256xf32>
    %c92_234 = arith.constant 92 : index
    %1106 = memref.load %arg0[%c92_234] : memref<96xf32, #tpu.memory_space<smem>>
    %1107 = vector.broadcast %1106 : f32 to vector<1x256xf32>
    %1108 = arith.mulf %1107, %941 : vector<1x256xf32>
    %c93_235 = arith.constant 93 : index
    %1109 = memref.load %arg0[%c93_235] : memref<96xf32, #tpu.memory_space<smem>>
    %1110 = vector.broadcast %1109 : f32 to vector<1x256xf32>
    %1111 = arith.mulf %1110, %942 : vector<1x256xf32>
    %1112 = arith.addf %1108, %1111 : vector<1x256xf32>
    %c94_236 = arith.constant 94 : index
    %1113 = memref.load %arg0[%c94_236] : memref<96xf32, #tpu.memory_space<smem>>
    %1114 = vector.broadcast %1113 : f32 to vector<1x256xf32>
    %1115 = arith.mulf %1114, %943 : vector<1x256xf32>
    %1116 = arith.addf %1112, %1115 : vector<1x256xf32>
    %c95_237 = arith.constant 95 : index
    %1117 = memref.load %arg0[%c95_237] : memref<96xf32, #tpu.memory_space<smem>>
    %1118 = vector.broadcast %1117 : f32 to vector<1x256xf32>
    %1119 = arith.mulf %1118, %944 : vector<1x256xf32>
    %1120 = arith.addf %1116, %1119 : vector<1x256xf32>
    %c46_238 = arith.constant 46 : index
    %1121 = memref.load %arg1[%c46_238] : memref<48xf32, #tpu.memory_space<smem>>
    %1122 = vector.broadcast %1121 : f32 to vector<1x256xf32>
    %1123 = arith.addf %1120, %1122 : vector<1x256xf32>
    %cst_239 = arith.constant 0.000000e+00 : f32
    %1124 = vector.broadcast %cst_239 : f32 to vector<1x256xf32>
    %1125 = arith.maximumf %1123, %1124 : vector<1x256xf32>
    %c47_240 = arith.constant 47 : index
    %1126 = memref.load %arg1[%c47_240] : memref<48xf32, #tpu.memory_space<smem>>
    %1127 = vector.broadcast %1126 : f32 to vector<1x256xf32>
    %1128 = arith.addf %1125, %1127 : vector<1x256xf32>
    %1129 = arith.addf %967, %31 : vector<1x256xf32>
    %1130 = arith.addf %990, %54 : vector<1x256xf32>
    %1131 = arith.addf %1013, %77 : vector<1x256xf32>
    %1132 = arith.addf %1036, %100 : vector<1x256xf32>
    %1133 = arith.addf %1059, %123 : vector<1x256xf32>
    %1134 = arith.addf %1082, %146 : vector<1x256xf32>
    %1135 = arith.addf %1105, %169 : vector<1x256xf32>
    %1136 = arith.addf %1128, %192 : vector<1x256xf32>
    %1137 = tpu.concatenate %1129, %1130, %1131, %1132, %1133, %1134, %1135, %1136 in 0 : vector<1x256xf32>, vector<1x256xf32>, vector<1x256xf32>, vector<1x256xf32>, vector<1x256xf32>, vector<1x256xf32>, vector<1x256xf32>, vector<1x256xf32> -> vector<8x256xf32>
    %c0_241 = arith.constant 0 : index
    %c0_242 = arith.constant 0 : index
    %1138 = vector.load %arg3[%c0_241, %c0_242] : memref<8x256xf32, #tpu.memory_space<vmem>>, vector<8x256xf32>
    tpu.vector_store %arg3[%c0_241, %c0_242], %1137 {strides = array<i32>} : memref<8x256xf32, #tpu.memory_space<vmem>>, vector<8x256xf32>,
    return
  }
}

</mosaic_0001>

<bundles_post_ra>
// kernel: unet_forward.1
= control target key start
LH: loop header
LB: loop body
LE: loop exit
PB: predicated region body
PF: predicated region fallthrough
CT: control target
= control target key end

     0   :  { %8 = vsyncpa [#allocation3], 0  ;;  %s1904_s0 = inlined_call_operand.vmem [shape: f32[96], index: 0, kind: input, shape index: {}]   ;;  %s1905_s1 = inlined_call_operand.vmem [shape: f32[48], index: 1, kind: input, shape index: {}]   ;;  %s1906_s2 = inlined_call_operand.vmem [shape: f32[8,256], index: 2, kind: input, shape index: {}]   ;;  %s1907_s3 = inlined_call_operand.vmem [shape: f32[8,256], index: 3, kind: output, shape index: {}]  }
   0x1   :  { %s16_s14 = sshll.u32 %s1904_s0, 4  ;;  %s17_s14 = int_to_ptr.vmem [resolvable:$true] %s16_s14 }
   0x2   :  { %9 = vsyncpa [#allocation5], 0  ;;  %s26_s17 = sshll.u32 %s1905_s1, 4  ;;  %s1096_s18 = scalar_lea.vmem %s17_s14, 16  ;;  %s27_s17 = int_to_ptr.vmem [resolvable:$true] %s26_s17 }
   0x3   :  { %p1097_p0 = scmp.ne.s32.totalorder %s17_s14, %s1096_s18  ;;  %p1101_p1 = scmp.lt.s32.totalorder %s17_s14, %s17_s14 }
   0x4   :  { %p1102_p2 = scmp.lt.s32.totalorder %s1096_s18, %s1096_s18 }
   0x6   :  { %p1103_p3 = por %p1102_p2, %p1101_p1 }
   0x8   :  { %p1104_p4 = pnand %p1103_p3, %p1097_p0 }
   0xa   :  { %1107 = shalt.err (!%p1104_p4)
}
   0xb   :  { %s1124_s19 = smov [#allocation2]   ;;  %s1108_s20 = scalar_lea.vmem %s27_s17, 16 }
   0xc   :  { %19 = dma.vmem_to_smem %s17_s14, 16, %s1124_s19, [#allocation3]  }
   0xd   :  { %p1109_p5 = scmp.ne.s32.totalorder %s27_s17, %s1108_s20  ;;  %p1113_p6 = scmp.lt.s32.totalorder %s27_s17, %s27_s17 }
   0xe   :  { %p1114_p7 = scmp.lt.s32.totalorder %s1108_s20, %s1108_s20 }
  0x10   :  { %p1115_p8 = por %p1114_p7, %p1113_p6 }
  0x12   :  { %p1116_p9 = pnand %p1115_p8, %p1109_p5 }
  0x14   :  { %1119 = shalt.err (!%p1116_p9)
}
  0x15   :  { %s1125_s0 = smov [#allocation4]  }
  0x16   :  { %29 = dma.vmem_to_smem %s27_s17, 16, %s1125_s0, [#allocation5]  }
  0x17   :  { %1120 = dma.done.wait [#allocation3], 16  }
  0x18   :  { %1121 = vsyncadd [#allocation3], 4294967280 }
  0x19   :  { %1122 = dma.done.wait [#allocation5], 16  }
  0x1a   :  { %1123 = vsyncadd [#allocation5], 4294967280 }
  0x1b   :  { %38 = sfence }
  0x1c   :  { %s41_s1 = sld [smem:[#allocation2]]  ;;  %v1157_v0 = vld [vmem:[%s1906_s2] sm:$0xff]  ;;  %v1162_v1 = vld [vmem:[%s1906_s2 + $0x8] sm:$0xff]  ;;  %vm923_vm0 = vcmask 1040384   ;;  %vm926_vm1 = vcmask 1041408   ;;  %vm929_vm2 = vcmask 1042432  }
  0x1d   :  { %s952_s21 = sld [smem:[#allocation2 + $0x1]]  ;;  %vm932_vm3 = vcmask 1043456   ;;  %vm935_vm4 = vcmask 1044480   ;;  %vm938_vm5 = vcmask 1045504   ;;  %vm941_vm6 = vcmask 1046528  }
  0x1e   :  { %s953_s22 = sld [smem:[#allocation2 + $0x2]] }
  0x1f   :  { %s954_s23 = sld [smem:[#allocation2 + $0x3]] }
  0x20   :  { %s1152_s24 = sld [smem:[#allocation4]] }
  0x21   :  { %s1164_s29 = sld [smem:[#allocation4 + $0x1]] }
  0x22   :  { %v42_v2 = vstv %s41_s1  ;;  %s1166_s30 = sld [smem:[#allocation2 + $0x4]] }
  0x23   :  { %v43_v3 = vmul.f32 %v42_v2, %v1157_v0  ;;  %v46_v4 = vstv %s952_s21  ;;  %s1169_s4 = sld [smem:[#allocation2 + $0x5]]  ;;  %v44_v5 = vmul.f32 %v42_v2, %v1162_v1 }
  0x24   :  { %v47_v6 = vmul.f32 %v46_v4, %v1157_v0  ;;  %v48_v7 = vmul.f32 %v46_v4, %v1162_v1  ;;  %v58_v8 = vstv %s953_s22  ;;  %s1174_s5 = sld [smem:[#allocation2 + $0x6]] }
  0x25   :  { %v59_v9 = vmul.f32 %v58_v8, %v1157_v0  ;;  %v60_v10 = vmul.f32 %v58_v8, %v1162_v1  ;;  %v70_v11 = vstv %s954_s23  ;;  %s1178_s2 = sld [smem:[#allocation2 + $0x7]] }
  0x26   :  { %v51_v12 = vrot.slane %v47_v6, 1  ;;  %v52_v13 = vrot.slane %v48_v7, 1  ;;  %v71_v14 = vmul.f32 %v70_v11, %v1157_v0  ;;  %v72_v15 = vmul.f32 %v70_v11, %v1162_v1  ;;  %s1182_s6 = sld [smem:[#allocation4 + $0x2]] }
  0x27   :  { %v63_v16 = vrot.slane %v59_v9, 2  ;;  %v64_v17 = vrot.slane %v60_v10, 2  ;;  %s1184_s7 = sld [smem:[#allocation4 + $0x3]]  ;;  %v82_v22 = vstv %s1152_s24  ;;  %v88_v23 = vstv %s1164_s29 }
  0x28   :  { %v55_v18 = vadd.f32 %v51_v12, %v43_v3  ;;  %v56_v19 = vadd.f32 %v52_v13, %v44_v5  ;;  %v75_v20 = vrot.slane %v71_v14, 3  ;;  %v76_v21 = vrot.slane %v72_v15, 3  ;;  %s1186_s8 = sld [smem:[#allocation2 + $0x8]] }
  0x29   :  { %v92_v24 = vstv %s1166_s30  ;;  %v96_v25 = vstv %s1169_s4  ;;  %s1192_s9 = sld [smem:[#allocation2 + $0x9]] }
  0x2a   :  { %v67_v26 = vadd.f32 %v63_v16, %v55_v18  ;;  %v68_v27 = vadd.f32 %v64_v17, %v56_v19  ;;  %v93_v28 = vmul.f32 %v92_v24, %v1157_v0  ;;  %v94_v29 = vmul.f32 %v92_v24, %v1162_v1  ;;  %s1196_s10 = sld [smem:[#allocation2 + $0xa]] }
  0x2b   :  { %v97_v30 = vmul.f32 %v96_v25, %v1157_v0  ;;  %v98_v31 = vmul.f32 %v96_v25, %v1162_v1  ;;  %v108_v32 = vstv %s1174_s5  ;;  %v120_v33 = vstv %s1178_s2  ;;  %s1202_s11 = sld [smem:[#allocation2 + $0xb]] }
  0x2c   :  { %v79_v34 = vadd.f32 %v75_v20, %v67_v26  ;;  %v80_v35 = vadd.f32 %v76_v21, %v68_v27  ;;  %v109_v36 = vmul.f32 %v108_v32, %v1157_v0  ;;  %v110_v37 = vmul.f32 %v108_v32, %v1162_v1  ;;  %s1206_s12 = sld [smem:[#allocation4 + $0x4]] }
  0x2d   :  { %v101_v38 = vrot.slane %v97_v30, 1  ;;  %v102_v39 = vrot.slane %v98_v31, 1  ;;  %v121_v40 = vmul.f32 %v120_v33, %v1157_v0  ;;  %v122_v41 = vmul.f32 %v120_v33, %v1162_v1  ;;  %s1210_s13 = sld [smem:[#allocation4 + $0x5]] }
  0x2e   :  { %v83_v42 = vadd.f32 %v82_v22, %v79_v34  ;;  %v84_v43 = vadd.f32 %v82_v22, %v80_v35  ;;  %v113_v44 = vrot.slane %v109_v36, 2  ;;  %v114_v45 = vrot.slane %v110_v37, 2  ;;  %s1214_s14 = sld [smem:[#allocation2 + $0xc]] }
  0x2f   :  { %v105_v46 = vadd.f32 %v101_v38, %v93_v28  ;;  %v106_v47 = vadd.f32 %v102_v39, %v94_v29  ;;  %v125_v48 = vrot.slane %v121_v40, 3  ;;  %v126_v49 = vrot.slane %v122_v41, 3  ;;  %s1218_s15 = sld [smem:[#allocation2 + $0xd]] }
  0x30   :  { %v85_v50 = vmax.f32 %v83_v42, 0.0  ;;  %v86_v51 = vmax.f32 %v84_v43, 0.0  ;;  %v132_v52 = vstv %s1182_s6  ;;  %v138_v53 = vstv %s1184_s7  ;;  %s1226_s16 = sld [smem:[#allocation2 + $0xe]] }
  0x31   :  { %v117_v54 = vadd.f32 %v113_v44, %v105_v46  ;;  %v118_v55 = vadd.f32 %v114_v45, %v106_v47  ;;  %v142_v56 = vstv %s1186_s8  ;;  %v146_v57 = vstv %s1192_s9  ;;  %s1230_s17 = sld [smem:[#allocation2 + $0xf]] }
  0x32   :  { %v1220_v58 = vadd.f32 %v88_v23, %v85_v50  ;;  %v1222_v59 = vadd.f32 %v88_v23, %v86_v51  ;;  %v143_v60 = vmul.f32 %v142_v56, %v1157_v0  ;;  %v144_v61 = vmul.f32 %v142_v56, %v1162_v1  ;;  %s1236_s18 = sld [smem:[#allocation4 + $0x6]] }
  0x33   :  { %v129_v62 = vadd.f32 %v125_v48, %v117_v54  ;;  %v130_v63 = vadd.f32 %v126_v49, %v118_v55  ;;  %v147_v2 = vmul.f32 %v146_v57, %v1157_v0  ;;  %v148_v3 = vmul.f32 %v146_v57, %v1162_v1  ;;  %s1242_s19 = sld [smem:[#allocation4 + $0x7]] }
  0x34   :  { %v158_v4 = vstv %s1196_s10  ;;  %v170_v5 = vstv %s1202_s11  ;;  %v182_v6 = vstv %s1206_s12  ;;  %v188_v7 = vstv %s1210_s13  ;;  %s1244_s20 = sld [smem:[#allocation2 + $0x10]] }
  0x35   :  { %v133_v8 = vadd.f32 %v132_v52, %v129_v62  ;;  %v134_v9 = vadd.f32 %v132_v52, %v130_v63  ;;  %v151_v10 = vrot.slane %v147_v2, 1  ;;  %v152_v11 = vrot.slane %v148_v3, 1  ;;  %s1246_s0 = sld [smem:[#allocation2 + $0x11]] }
  0x36   :  { %v159_v12 = vmul.f32 %v158_v4, %v1157_v0  ;;  %v160_v13 = vmul.f32 %v158_v4, %v1162_v1  ;;  %v171_v14 = vmul.f32 %v170_v5, %v1157_v0  ;;  %v172_v15 = vmul.f32 %v170_v5, %v1162_v1  ;;  %s1254_s1 = sld [smem:[#allocation2 + $0x12]] }
  0x37   :  { %v135_v16 = vmax.f32 %v133_v8, 0.0  ;;  %v136_v17 = vmax.f32 %v134_v9, 0.0  ;;  %v155_v18 = vadd.f32 %v151_v10, %v143_v60  ;;  %v156_v19 = vadd.f32 %v152_v11, %v144_v61  ;;  %s1258_s21 = sld [smem:[#allocation2 + $0x13]] }
  0x38   :  { %v163_v20 = vrot.slane %v159_v12, 2  ;;  %v164_v21 = vrot.slane %v160_v13, 2  ;;  %v175_v22 = vrot.slane %v171_v14, 3  ;;  %v176_v23 = vrot.slane %v172_v15, 3  ;;  %s1264_s22 = sld [smem:[#allocation4 + $0x8]] }
  0x39   :  { %v1248_v24 = vadd.f32 %v138_v53, %v135_v16  ;;  %v1250_v25 = vadd.f32 %v138_v53, %v136_v17  ;;  %v192_v26 = vstv %s1214_s14  ;;  %v196_v27 = vstv %s1218_s15  ;;  %s1268_s23 = sld [smem:[#allocation4 + $0x9]] }
  0x3a   :  { %v167_v28 = vadd.f32 %v163_v20, %v155_v18  ;;  %v168_v29 = vadd.f32 %v164_v21, %v156_v19  ;;  %v193_v30 = vmul.f32 %v192_v26, %v1157_v0  ;;  %v194_v31 = vmul.f32 %v192_v26, %v1162_v1  ;;  %s1272_s24 = sld [smem:[#allocation2 + $0x14]] }
  0x3b   :  { %v197_v32 = vmul.f32 %v196_v27, %v1157_v0  ;;  %v198_v33 = vmul.f32 %v196_v27, %v1162_v1  ;;  %v208_v34 = vstv %s1226_s16  ;;  %v220_v35 = vstv %s1230_s17  ;;  %s1274_s25 = sld [smem:[#allocation2 + $0x15]] }
  0x3c   :  { %v179_v36 = vadd.f32 %v175_v22, %v167_v28  ;;  %v180_v37 = vadd.f32 %v176_v23, %v168_v29  ;;  %v209_v38 = vmul.f32 %v208_v34, %v1157_v0  ;;  %v210_v39 = vmul.f32 %v208_v34, %v1162_v1  ;;  %s1278_s26 = sld [smem:[#allocation2 + $0x16]] }
  0x3d   :  { %v201_v40 = vrot.slane %v197_v32, 1  ;;  %v202_v41 = vrot.slane %v198_v33, 1  ;;  %v221_v42 = vmul.f32 %v220_v35, %v1157_v0  ;;  %v222_v43 = vmul.f32 %v220_v35, %v1162_v1  ;;  %s1282_s27 = sld [smem:[#allocation2 + $0x17]] }
  0x3e   :  { %v183_v44 = vadd.f32 %v182_v6, %v179_v36  ;;  %v184_v45 = vadd.f32 %v182_v6, %v180_v37  ;;  %v213_v46 = vrot.slane %v209_v38, 2  ;;  %v214_v47 = vrot.slane %v210_v39, 2  ;;  %s1294_s28 = sld [smem:[#allocation4 + $0xa]] }
  0x3f   :  { %v205_v48 = vadd.f32 %v201_v40, %v193_v30  ;;  %v206_v49 = vadd.f32 %v202_v41, %v194_v31  ;;  %v225_v50 = vrot.slane %v221_v42, 3  ;;  %v226_v51 = vrot.slane %v222_v43, 3  ;;  %s1298_s29 = sld [smem:[#allocation4 + $0xb]] }
  0x40   :  { %v185_v52 = vmax.f32 %v183_v44, 0.0  ;;  %v186_v0 = vmax.f32 %v184_v45, 0.0  ;;  %v232_v53 = vstv %s1236_s18  ;;  %v238_v1 = vstv %s1242_s19  ;;  %s1304_s30 = sld [smem:[#allocation2 + $0x18]] }
  0x41   :  { %v217_v54 = vadd.f32 %v213_v46, %v205_v48  ;;  %v218_v55 = vadd.f32 %v214_v47, %v206_v49  ;;  %v242_v56 = vstv %s1244_s20  ;;  %v246_v57 = vstv %s1246_s0  ;;  %s1306_s4 = sld [smem:[#allocation2 + $0x19]] }
  0x42   :  { %v1286_v60 = vadd.f32 %v188_v7, %v185_v52  ;;  %v1290_v61 = vadd.f32 %v188_v7, %v186_v0  ;;  %v243_v62 = vmul.f32 %v242_v56, %v1220_v58  ;;  %v244_v63 = vmul.f32 %v242_v56, %v1222_v59  ;;  %s1314_s5 = sld [smem:[#allocation2 + $0x1a]] }
  0x43   :  { %v229_v2 = vadd.f32 %v225_v50, %v217_v54  ;;  %v230_v3 = vadd.f32 %v226_v51, %v218_v55  ;;  %v247_v4 = vmul.f32 %v246_v57, %v1248_v24  ;;  %v248_v5 = vmul.f32 %v246_v57, %v1250_v25  ;;  %s1318_s2 = sld [smem:[#allocation2 + $0x1b]] }
  0x44   :  { %v252_v6 = vstv %s1254_s1  ;;  %v258_v8 = vstv %s1258_s21  ;;  %v264_v7 = vstv %s1264_s22  ;;  %v270_v9 = vstv %s1268_s23  ;;  %s1326_s6 = sld [smem:[#allocation4 + $0xc]] }
  0x45   :  { %v233_v10 = vadd.f32 %v232_v53, %v229_v2  ;;  %v234_v11 = vadd.f32 %v232_v53, %v230_v3  ;;  %v249_v12 = vadd.f32 %v247_v4, %v243_v62  ;;  %v250_v13 = vadd.f32 %v248_v5, %v244_v63  ;;  %s1330_s7 = sld [smem:[#allocation4 + $0xd]] }
  0x46   :  { %v253_v14 = vmul.f32 %v252_v6, %v1286_v60  ;;  %v254_v15 = vmul.f32 %v252_v6, %v1290_v61  ;;  %v274_v16 = vstv %s1272_s24  ;;  %v278_v17 = vstv %s1274_s25  ;;  %s1336_s8 = sld [smem:[#allocation2 + $0x1c]] }
  0x47   :  { %v235_v18 = vmax.f32 %v233_v10, 0.0  ;;  %v236_v19 = vmax.f32 %v234_v11, 0.0  ;;  %v275_v20 = vmul.f32 %v274_v16, %v1220_v58  ;;  %v276_v21 = vmul.f32 %v274_v16, %v1222_v59  ;;  %s1340_s9 = sld [smem:[#allocation2 + $0x1d]] }
  0x48   :  { %v255_v22 = vadd.f32 %v253_v14, %v249_v12  ;;  %v256_v23 = vadd.f32 %v254_v15, %v250_v13  ;;  %v279_v26 = vmul.f32 %v278_v17, %v1248_v24  ;;  %v280_v27 = vmul.f32 %v278_v17, %v1250_v25  ;;  %s1344_s10 = sld [smem:[#allocation2 + $0x1e]] }
  0x49   :  { %v1320_v28 = vadd.f32 %v238_v1, %v235_v18  ;;  %v1322_v29 = vadd.f32 %v238_v1, %v236_v19  ;;  %v284_v30 = vstv %s1278_s26  ;;  %v290_v31 = vstv %s1282_s27  ;;  %s1348_s11 = sld [smem:[#allocation2 + $0x1f]] }
  0x4a   :  { %v281_v32 = vadd.f32 %v279_v26, %v275_v20  ;;  %v282_v33 = vadd.f32 %v280_v27, %v276_v21  ;;  %v285_v34 = vmul.f32 %v284_v30, %v1286_v60  ;;  %v286_v35 = vmul.f32 %v284_v30, %v1290_v61  ;;  %s1352_s12 = sld [smem:[#allocation4 + $0xe]] }
  0x4b   :  { %v259_v36 = vmul.f32 %v258_v8, %v1320_v28  ;;  %v260_v37 = vmul.f32 %v258_v8, %v1322_v29  ;;  %v291_v38 = vmul.f32 %v290_v31, %v1320_v28  ;;  %v292_v39 = vmul.f32 %v290_v31, %v1322_v29  ;;  %s1356_s13 = sld [smem:[#allocation4 + $0xf]] }
  0x4c   :  { %v287_v40 = vadd.f32 %v285_v34, %v281_v32  ;;  %v288_v41 = vadd.f32 %v286_v35, %v282_v33  ;;  %v296_v42 = vstv %s1294_s28  ;;  %v302_v43 = vstv %s1298_s29  ;;  %s1358_s14 = sld [smem:[#allocation2 + $0x20]] }
  0x4d   :  { %v261_v44 = vadd.f32 %v259_v36, %v255_v22  ;;  %v262_v45 = vadd.f32 %v260_v37, %v256_v23  ;;  %v306_v46 = vstv %s1304_s30  ;;  %v310_v47 = vstv %s1306_s4  ;;  %s1362_s15 = sld [smem:[#allocation2 + $0x21]] }
  0x4e   :  { %v293_v48 = vadd.f32 %v291_v38, %v287_v40  ;;  %v294_v49 = vadd.f32 %v292_v39, %v288_v41  ;;  %v307_v50 = vmul.f32 %v306_v46, %v1220_v58  ;;  %v308_v51 = vmul.f32 %v306_v46, %v1222_v59  ;;  %s1374_s16 = sld [smem:[#allocation2 + $0x22]] }
  0x4f   :  { %v265_v52 = vadd.f32 %v264_v7, %v261_v44  ;;  %v266_v0 = vadd.f32 %v264_v7, %v262_v45  ;;  %v311_v53 = vmul.f32 %v310_v47, %v1248_v24  ;;  %v312_v1 = vmul.f32 %v310_v47, %v1250_v25  ;;  %s1380_s17 = sld [smem:[#allocation2 + $0x23]] }
  0x50   :  { %v297_v54 = vadd.f32 %v296_v42, %v293_v48  ;;  %v298_v55 = vadd.f32 %v296_v42, %v294_v49  ;;  %v316_v56 = vstv %s1314_s5  ;;  %v322_v57 = vstv %s1318_s2  ;;  %s1386_s18 = sld [smem:[#allocation4 + $0x10]] }
  0x51   :  { %v267_v62 = vmax.f32 %v265_v52, 0.0  ;;  %v268_v63 = vmax.f32 %v266_v0, 0.0  ;;  %v313_v2 = vadd.f32 %v311_v53, %v307_v50  ;;  %v314_v3 = vadd.f32 %v312_v1, %v308_v51  ;;  %s1390_s19 = sld [smem:[#allocation4 + $0x11]] }
  0x52   :  { %v299_v4 = vmax.f32 %v297_v54, 0.0  ;;  %v300_v5 = vmax.f32 %v298_v55, 0.0  ;;  %v317_v6 = vmul.f32 %v316_v56, %v1286_v60  ;;  %v318_v8 = vmul.f32 %v316_v56, %v1290_v61  ;;  %s1396_s20 = sld [smem:[#allocation2 + $0x24]] }
  0x53   :  { %v1366_v7 = vadd.f32 %v270_v9, %v267_v62  ;;  %v1370_v10 = vadd.f32 %v270_v9, %v268_v63  ;;  %v323_v11 = vmul.f32 %v322_v57, %v1320_v28  ;;  %v324_v12 = vmul.f32 %v322_v57, %v1322_v29  ;;  %s1400_s0 = sld [smem:[#allocation2 + $0x25]] }
  0x54   :  { %v1376_v13 = vadd.f32 %v302_v43, %v299_v4  ;;  %v1378_v14 = vadd.f32 %v302_v43, %v300_v5  ;;  %v319_v15 = vadd.f32 %v317_v6, %v313_v2  ;;  %v320_v16 = vadd.f32 %v318_v8, %v314_v3  ;;  %s1406_s1 = sld [smem:[#allocation2 + $0x26]] }
  0x55   :  { %v328_v17 = vstv %s1326_s6  ;;  %v334_v18 = vstv %s1330_s7  ;;  %v338_v9 = vstv %s1336_s8  ;;  %v342_v19 = vstv %s1340_s9  ;;  %s1410_s21 = sld [smem:[#allocation2 + $0x27]] }
  0x56   :  { %v325_v20 = vadd.f32 %v323_v11, %v319_v15  ;;  %v326_v21 = vadd.f32 %v324_v12, %v320_v16  ;;  %v339_v22 = vmul.f32 %v338_v9, %v1220_v58  ;;  %v340_v23 = vmul.f32 %v338_v9, %v1222_v59  ;;  %s1418_s22 = sld [smem:[#allocation4 + $0x12]] }
  0x57   :  { %v343_v26 = vmul.f32 %v342_v19, %v1248_v24  ;;  %v344_v27 = vmul.f32 %v342_v19, %v1250_v25  ;;  %v348_v30 = vstv %s1344_s10  ;;  %v354_v31 = vstv %s1348_s11  ;;  %s1422_s23 = sld [smem:[#allocation4 + $0x13]] }
  0x58   :  { %v329_v32 = vadd.f32 %v328_v17, %v325_v20  ;;  %v330_v33 = vadd.f32 %v328_v17, %v326_v21  ;;  %v349_v34 = vmul.f32 %v348_v30, %v1286_v60  ;;  %v350_v35 = vmul.f32 %v348_v30, %v1290_v61  ;;  %s1428_s24 = sld [smem:[#allocation2 + $0x28]] }
  0x59   :  { %v345_v36 = vadd.f32 %v343_v26, %v339_v22  ;;  %v346_v37 = vadd.f32 %v344_v27, %v340_v23  ;;  %v355_v38 = vmul.f32 %v354_v31, %v1320_v28  ;;  %v356_v39 = vmul.f32 %v354_v31, %v1322_v29  ;;  %s1430_s25 = sld [smem:[#allocation2 + $0x29]] }
  0x5a   :  { %v331_v40 = vmax.f32 %v329_v32, 0.0  ;;  %v332_v41 = vmax.f32 %v330_v33, 0.0  ;;  %v360_v42 = vstv %s1352_s12  ;;  %v366_v43 = vstv %s1356_s13  ;;  %s1438_s26 = sld [smem:[#allocation2 + $0x2a]] }
  0x5b   :  { %v351_v44 = vadd.f32 %v349_v34, %v345_v36  ;;  %v352_v45 = vadd.f32 %v350_v35, %v346_v37  ;;  %v370_v46 = vstv %s1358_s14  ;;  %v374_v47 = vstv %s1362_s15  ;;  %s1442_s27 = sld [smem:[#allocation2 + $0x2b]] }
  0x5c   :  { %v1412_v48 = vadd.f32 %v334_v18, %v331_v40  ;;  %v1414_v49 = vadd.f32 %v334_v18, %v332_v41  ;;  %v371_v50 = vmul.f32 %v370_v46, %v1366_v7  ;;  %v372_v51 = vmul.f32 %v370_v46, %v1370_v10  ;;  %s1450_s28 = sld [smem:[#allocation4 + $0x14]] }
  0x5d   :  { %v357_v52 = vadd.f32 %v355_v38, %v351_v44  ;;  %v358_v0 = vadd.f32 %v356_v39, %v352_v45  ;;  %v375_v53 = vmul.f32 %v374_v47, %v1376_v13  ;;  %v376_v1 = vmul.f32 %v374_v47, %v1378_v14  ;;  %s1454_s29 = sld [smem:[#allocation4 + $0x15]] }
  0x5e   :  { %v380_v54 = vstv %s1374_s16  ;;  %v386_v55 = vstv %s1380_s17  ;;  %v392_v56 = vstv %s1386_s18  ;;  %v398_v57 = vstv %s1390_s19  ;;  %s1460_s30 = sld [smem:[#allocation2 + $0x2c]] }
  0x5f   :  { %v361_v62 = vadd.f32 %v360_v42, %v357_v52  ;;  %v362_v63 = vadd.f32 %v360_v42, %v358_v0  ;;  %v377_v2 = vadd.f32 %v375_v53, %v371_v50  ;;  %v378_v3 = vadd.f32 %v376_v1, %v372_v51  ;;  %s1464_s4 = sld [smem:[#allocation2 + $0x2d]] }
  0x60   :  { %v381_v4 = vmul.f32 %v380_v54, %v1412_v48  ;;  %v382_v5 = vmul.f32 %v380_v54, %v1414_v49  ;;  %v402_v6 = vstv %s1396_s20  ;;  %v406_v8 = vstv %s1400_s0  ;;  %s1468_s5 = sld [smem:[#allocation2 + $0x2e]] }
  0x61   :  { %v363_v11 = vmax.f32 %v361_v62, 0.0  ;;  %v364_v12 = vmax.f32 %v362_v63, 0.0  ;;  %v403_v15 = vmul.f32 %v402_v6, %v1366_v7  ;;  %v404_v16 = vmul.f32 %v402_v6, %v1370_v10  ;;  %s1472_s2 = sld [smem:[#allocation2 + $0x2f]] }
  0x62   :  { %v383_v17 = vadd.f32 %v381_v4, %v377_v2  ;;  %v384_v18 = vadd.f32 %v382_v5, %v378_v3  ;;  %v407_v9 = vmul.f32 %v406_v8, %v1376_v13  ;;  %v408_v19 = vmul.f32 %v406_v8, %v1378_v14  ;;  %s1476_s6 = sld [smem:[#allocation4 + $0x16]] }
  0x63   :  { %v1444_v20 = vadd.f32 %v366_v43, %v363_v11  ;;  %v1446_v21 = vadd.f32 %v366_v43, %v364_v12  ;;  %v412_v22 = vstv %s1406_s1  ;;  %v418_v23 = vstv %s1410_s21  ;;  %s1480_s7 = sld [smem:[#allocation4 + $0x17]] }
  0x64   :  { %v409_v26 = vadd.f32 %v407_v9, %v403_v15  ;;  %v410_v27 = vadd.f32 %v408_v19, %v404_v16  ;;  %v413_v30 = vmul.f32 %v412_v22, %v1412_v48  ;;  %v414_v31 = vmul.f32 %v412_v22, %v1414_v49  ;;  %s1482_s8 = sld [smem:[#allocation2 + $0x30]] }
  0x65   :  { %v387_v32 = vmul.f32 %v386_v55, %v1444_v20  ;;  %v388_v33 = vmul.f32 %v386_v55, %v1446_v21  ;;  %v419_v34 = vmul.f32 %v418_v23, %v1444_v20  ;;  %v420_v35 = vmul.f32 %v418_v23, %v1446_v21  ;;  %s1486_s9 = sld [smem:[#allocation2 + $0x31]] }
  0x66   :  { %v415_v36 = vadd.f32 %v413_v30, %v409_v26  ;;  %v416_v37 = vadd.f32 %v414_v31, %v410_v27  ;;  %v424_v38 = vstv %s1418_s22  ;;  %v430_v39 = vstv %s1422_s23  ;;  %s1498_s10 = sld [smem:[#allocation2 + $0x32]] }
  0x67   :  { %v389_v40 = vadd.f32 %v387_v32, %v383_v17  ;;  %v390_v41 = vadd.f32 %v388_v33, %v384_v18  ;;  %v434_v42 = vstv %s1428_s24  ;;  %v438_v43 = vstv %s1430_s25  ;;  %s1504_s11 = sld [smem:[#allocation2 + $0x33]] }
  0x68   :  { %v421_v44 = vadd.f32 %v419_v34, %v415_v36  ;;  %v422_v45 = vadd.f32 %v420_v35, %v416_v37  ;;  %v435_v46 = vmul.f32 %v434_v42, %v1366_v7  ;;  %v436_v47 = vmul.f32 %v434_v42, %v1370_v10  ;;  %s1510_s12 = sld [smem:[#allocation4 + $0x18]] }
  0x69   :  { %v393_v50 = vadd.f32 %v392_v56, %v389_v40  ;;  %v394_v51 = vadd.f32 %v392_v56, %v390_v41  ;;  %v439_v52 = vmul.f32 %v438_v43, %v1376_v13  ;;  %v440_v0 = vmul.f32 %v438_v43, %v1378_v14  ;;  %s1514_s13 = sld [smem:[#allocation4 + $0x19]] }
  0x6a   :  { %v425_v53 = vadd.f32 %v424_v38, %v421_v44  ;;  %v426_v1 = vadd.f32 %v424_v38, %v422_v45  ;;  %v444_v54 = vstv %s1438_s26  ;;  %v450_v55 = vstv %s1442_s27  ;;  %s1520_s14 = sld [smem:[#allocation2 + $0x34]] }
  0x6b   :  { %v395_v62 = vmax.f32 %v393_v50, 0.0  ;;  %v396_v63 = vmax.f32 %v394_v51, 0.0  ;;  %v441_v2 = vadd.f32 %v439_v52, %v435_v46  ;;  %v442_v3 = vadd.f32 %v440_v0, %v436_v47  ;;  %s1524_s15 = sld [smem:[#allocation2 + $0x35]] }
  0x6c   :  { %v427_v56 = vmax.f32 %v425_v53, 0.0  ;;  %v428_v4 = vmax.f32 %v426_v1, 0.0  ;;  %v445_v5 = vmul.f32 %v444_v54, %v1412_v48  ;;  %v446_v6 = vmul.f32 %v444_v54, %v1414_v49  ;;  %s1530_s16 = sld [smem:[#allocation2 + $0x36]] }
  0x6d   :  { %v1490_v8 = vadd.f32 %v398_v57, %v395_v62  ;;  %v1494_v11 = vadd.f32 %v398_v57, %v396_v63  ;;  %v451_v12 = vmul.f32 %v450_v55, %v1444_v20  ;;  %v452_v15 = vmul.f32 %v450_v55, %v1446_v21  ;;  %s1534_s17 = sld [smem:[#allocation2 + $0x37]] }
  0x6e   :  { %v1500_v16 = vadd.f32 %v430_v39, %v427_v56  ;;  %v1502_v17 = vadd.f32 %v430_v39, %v428_v4  ;;  %v447_v18 = vadd.f32 %v445_v5, %v441_v2  ;;  %v448_v9 = vadd.f32 %v446_v6, %v442_v3  ;;  %s1542_s18 = sld [smem:[#allocation4 + $0x1a]] }
  0x6f   :  { %v456_v19 = vstv %s1450_s28  ;;  %v462_v22 = vstv %s1454_s29  ;;  %v466_v57 = vstv %s1460_s30  ;;  %v470_v23 = vstv %s1464_s4  ;;  %s1546_s19 = sld [smem:[#allocation4 + $0x1b]] }
  0x70   :  { %v453_v26 = vadd.f32 %v451_v12, %v447_v18  ;;  %v454_v27 = vadd.f32 %v452_v15, %v448_v9  ;;  %v467_v30 = vmul.f32 %v466_v57, %v1366_v7  ;;  %v468_v31 = vmul.f32 %v466_v57, %v1370_v10  ;;  %s1552_s20 = sld [smem:[#allocation2 + $0x38]] }
  0x71   :  { %v471_v32 = vmul.f32 %v470_v23, %v1376_v13  ;;  %v472_v33 = vmul.f32 %v470_v23, %v1378_v14  ;;  %v476_v34 = vstv %s1468_s5  ;;  %v482_v35 = vstv %s1472_s2  ;;  %s1554_s0 = sld [smem:[#allocation2 + $0x39]] }
  0x72   :  { %v457_v36 = vadd.f32 %v456_v19, %v453_v26  ;;  %v458_v37 = vadd.f32 %v456_v19, %v454_v27  ;;  %v477_v38 = vmul.f32 %v476_v34, %v1412_v48  ;;  %v478_v39 = vmul.f32 %v476_v34, %v1414_v49  ;;  %s1562_s1 = sld [smem:[#allocation2 + $0x3a]] }
  0x73   :  { %v473_v40 = vadd.f32 %v471_v32, %v467_v30  ;;  %v474_v41 = vadd.f32 %v472_v33, %v468_v31  ;;  %v483_v42 = vmul.f32 %v482_v35, %v1444_v20  ;;  %v484_v43 = vmul.f32 %v482_v35, %v1446_v21  ;;  %s1566_s21 = sld [smem:[#allocation2 + $0x3b]] }
  0x74   :  { %v459_v44 = vmax.f32 %v457_v36, 0.0  ;;  %v460_v45 = vmax.f32 %v458_v37, 0.0  ;;  %v488_v46 = vstv %s1476_s6  ;;  %v494_v47 = vstv %s1480_s7  ;;  %s1576_s22 = sld [smem:[#allocation4 + $0x1c]] }
  0x75   :  { %v479_v50 = vadd.f32 %v477_v38, %v473_v40  ;;  %v480_v51 = vadd.f32 %v478_v39, %v474_v41  ;;  %v498_v52 = vstv %s1482_s8  ;;  %v502_v0 = vstv %s1486_s9  ;;  %s1582_s23 = sld [smem:[#allocation4 + $0x1d]] }
  0x76   :  { %v1536_v53 = vadd.f32 %v462_v22, %v459_v44  ;;  %v1538_v1 = vadd.f32 %v462_v22, %v460_v45  ;;  %v499_v54 = vmul.f32 %v498_v52, %v1490_v8  ;;  %v500_v55 = vmul.f32 %v498_v52, %v1494_v11  ;;  %s1586_s24 = sld [smem:[#allocation2 + $0x3c]] }
  0x77   :  { %v485_v62 = vadd.f32 %v483_v42, %v479_v50  ;;  %v486_v63 = vadd.f32 %v484_v43, %v480_v51  ;;  %v503_v2 = vmul.f32 %v502_v0, %v1500_v16  ;;  %v504_v3 = vmul.f32 %v502_v0, %v1502_v17  ;;  %s1590_s25 = sld [smem:[#allocation2 + $0x3d]] }
  0x78   :  { %v508_v56 = vstv %s1498_s10  ;;  %v514_v4 = vstv %s1504_s11  ;;  %v520_v5 = vstv %s1510_s12  ;;  %v526_v6 = vstv %s1514_s13  ;;  %s1594_s26 = sld [smem:[#allocation2 + $0x3e]] }
  0x79   :  { %v489_v12 = vadd.f32 %v488_v46, %v485_v62  ;;  %v490_v15 = vadd.f32 %v488_v46, %v486_v63  ;;  %v505_v18 = vadd.f32 %v503_v2, %v499_v54  ;;  %v506_v9 = vadd.f32 %v504_v3, %v500_v55  ;;  %s1598_s27 = sld [smem:[#allocation2 + $0x3f]] }
  0x7a   :  { %v509_v19 = vmul.f32 %v508_v56, %v1536_v53  ;;  %v510_v22 = vmul.f32 %v508_v56, %v1538_v1  ;;  %v530_v57 = vstv %s1520_s14  ;;  %v534_v23 = vstv %s1524_s15  ;;  %s1602_s28 = sld [smem:[#allocation4 + $0x1e]] }
  0x7b   :  { %v491_v26 = vmax.f32 %v489_v12, 0.0  ;;  %v492_v27 = vmax.f32 %v490_v15, 0.0  ;;  %v531_v30 = vmul.f32 %v530_v57, %v1490_v8  ;;  %v532_v31 = vmul.f32 %v530_v57, %v1494_v11  ;;  %s1606_s29 = sld [smem:[#allocation4 + $0x1f]] }
  0x7c   :  { %v511_v32 = vadd.f32 %v509_v19, %v505_v18  ;;  %v512_v33 = vadd.f32 %v510_v22, %v506_v9  ;;  %v535_v34 = vmul.f32 %v534_v23, %v1500_v16  ;;  %v536_v35 = vmul.f32 %v534_v23, %v1502_v17  ;;  %s1614_s30 = sld [smem:[#allocation2 + $0x40]] }
  0x7d   :  { %v1568_v36 = vadd.f32 %v494_v47, %v491_v26  ;;  %v1570_v37 = vadd.f32 %v494_v47, %v492_v27  ;;  %v540_v38 = vstv %s1530_s16  ;;  %v546_v39 = vstv %s1534_s17  ;;  %s1616_s4 = sld [smem:[#allocation2 + $0x41]] }
  0x7e   :  { %v537_v40 = vadd.f32 %v535_v34, %v531_v30  ;;  %v538_v41 = vadd.f32 %v536_v35, %v532_v31  ;;  %v541_v42 = vmul.f32 %v540_v38, %v1536_v53  ;;  %v542_v43 = vmul.f32 %v540_v38, %v1538_v1  ;;  %s1622_s5 = sld [smem:[#allocation2 + $0x42]] }
  0x7f   :  { %v515_v44 = vmul.f32 %v514_v4, %v1568_v36  ;;  %v516_v45 = vmul.f32 %v514_v4, %v1570_v37  ;;  %v547_v46 = vmul.f32 %v546_v39, %v1568_v36  ;;  %v548_v47 = vmul.f32 %v546_v39, %v1570_v37  ;;  %s1626_s2 = sld [smem:[#allocation2 + $0x43]] }
  0x80   :  { %v543_v50 = vadd.f32 %v541_v42, %v537_v40  ;;  %v544_v51 = vadd.f32 %v542_v43, %v538_v41  ;;  %v552_v52 = vstv %s1542_s18  ;;  %v558_v0 = vstv %s1546_s19  ;;  %s1632_s6 = sld [smem:[#allocation4 + $0x20]] }
  0x81   :  { %v517_v54 = vadd.f32 %v515_v44, %v511_v32  ;;  %v518_v55 = vadd.f32 %v516_v45, %v512_v33  ;;  %v562_v62 = vstv %s1552_s20  ;;  %v566_v63 = vstv %s1554_s0  ;;  %s1636_s7 = sld [smem:[#allocation4 + $0x21]] }
  0x82   :  { %v549_v2 = vadd.f32 %v547_v46, %v543_v50  ;;  %v550_v3 = vadd.f32 %v548_v47, %v544_v51  ;;  %v563_v56 = vmul.f32 %v562_v62, %v1490_v8  ;;  %v564_v4 = vmul.f32 %v562_v62, %v1494_v11  ;;  %s1640_s8 = sld [smem:[#allocation2 + $0x44]] }
  0x83   :  { %v521_v12 = vadd.f32 %v520_v5, %v517_v54  ;;  %v522_v15 = vadd.f32 %v520_v5, %v518_v55  ;;  %v567_v18 = vmul.f32 %v566_v63, %v1500_v16  ;;  %v568_v9 = vmul.f32 %v566_v63, %v1502_v17  ;;  %s1644_s9 = sld [smem:[#allocation2 + $0x45]] }
  0x84   :  { %v553_v19 = vadd.f32 %v552_v52, %v549_v2  ;;  %v554_v22 = vadd.f32 %v552_v52, %v550_v3  ;;  %v572_v57 = vstv %s1562_s1  ;;  %v578_v23 = vstv %s1566_s21  ;;  %s1658_s10 = sld [smem:[#allocation2 + $0x46]] }
  0x85   :  { %v523_v26 = vmax.f32 %v521_v12, 0.0  ;;  %v524_v27 = vmax.f32 %v522_v15, 0.0  ;;  %v569_v30 = vadd.f32 %v567_v18, %v563_v56  ;;  %v570_v31 = vadd.f32 %v568_v9, %v564_v4  ;;  %s1662_s11 = sld [smem:[#allocation2 + $0x47]] }
  0x86   :  { %v555_v5 = vmax.f32 %v553_v19, 0.0  ;;  %v556_v32 = vmax.f32 %v554_v22, 0.0  ;;  %v573_v33 = vmul.f32 %v572_v57, %v1536_v53  ;;  %v574_v34 = vmul.f32 %v572_v57, %v1538_v1  ;;  %s1672_s12 = sld [smem:[#allocation4 + $0x22]] }
  0x87   :  { %v527_v35 = vadd.f32 %v526_v6, %v523_v26  ;;  %v528_v38 = vadd.f32 %v526_v6, %v524_v27  ;;  %v579_v39 = vmul.f32 %v578_v23, %v1568_v36  ;;  %v580_v40 = vmul.f32 %v578_v23, %v1570_v37  ;;  %s1676_s13 = sld [smem:[#allocation4 + $0x23]] }
  0x88   :  { %v559_v41 = vadd.f32 %v558_v0, %v555_v5  ;;  %v560_v42 = vadd.f32 %v558_v0, %v556_v32  ;;  %v575_v43 = vadd.f32 %v573_v33, %v569_v30  ;;  %v576_v44 = vadd.f32 %v574_v34, %v570_v31  ;;  %s1682_s14 = sld [smem:[#allocation2 + $0x48]] }
  0x89   :  { %v584_v45 = vstv %s1576_s22  ;;  %v590_v46 = vstv %s1582_s23  ;;  %v594_v47 = vstv %s1586_s24  ;;  %v598_v50 = vstv %s1590_s25  ;;  %s1684_s15 = sld [smem:[#allocation2 + $0x49]] }
  0x8a   :  { %v581_v6 = vadd.f32 %v579_v39, %v575_v43  ;;  %v582_v51 = vadd.f32 %v580_v40, %v576_v44  ;;  %v595_v52 = vmul.f32 %v594_v47, %v1490_v8  ;;  %v596_v54 = vmul.f32 %v594_v47, %v1494_v11  ;;  %s1692_s16 = sld [smem:[#allocation2 + $0x4a]] }
  0x8b   :  { %v599_v0 = vmul.f32 %v598_v50, %v1500_v16  ;;  %v600_v55 = vmul.f32 %v598_v50, %v1502_v17  ;;  %v604_v62 = vstv %s1594_s26  ;;  %v610_v63 = vstv %s1598_s27  ;;  %s1696_s17 = sld [smem:[#allocation2 + $0x4b]] }
  0x8c   :  { %v585_v2 = vadd.f32 %v584_v45, %v581_v6  ;;  %v586_v3 = vadd.f32 %v584_v45, %v582_v51  ;;  %v605_v56 = vmul.f32 %v604_v62, %v1536_v53  ;;  %v606_v4 = vmul.f32 %v604_v62, %v1538_v1  ;;  %s1708_s18 = sld [smem:[#allocation4 + $0x24]] }
  0x8d   :  { %v601_v12 = vadd.f32 %v599_v0, %v595_v52  ;;  %v602_v15 = vadd.f32 %v600_v55, %v596_v54  ;;  %v611_v18 = vmul.f32 %v610_v63, %v1568_v36  ;;  %v612_v9 = vmul.f32 %v610_v63, %v1570_v37  ;;  %s1714_s19 = sld [smem:[#allocation4 + $0x25]] }
  0x8e   :  { %v587_v19 = vmax.f32 %v585_v2, 0.0  ;;  %v588_v22 = vmax.f32 %v586_v3, 0.0  ;;  %v616_v57 = vstv %s1602_s28  ;;  %v622_v23 = vstv %s1606_s29  ;;  %s1718_s20 = sld [smem:[#allocation2 + $0x4c]] }
  0x8f   :  { %v607_v26 = vadd.f32 %v605_v56, %v601_v12  ;;  %v608_v27 = vadd.f32 %v606_v4, %v602_v15  ;;  %v1647_v30 = vadd.f32 %v527_v35, %v1490_v8  ;;  %v1650_v31 = vadd.f32 %v528_v38, %v1494_v11  ;;  %s1722_s0 = sld [smem:[#allocation2 + $0x4d]] }
  0x90   :  { %v591_v5 = vadd.f32 %v590_v46, %v587_v19  ;;  %v592_v32 = vadd.f32 %v590_v46, %v588_v22  ;;  %v1653_v33 = vadd.f32 %v559_v41, %v1500_v16  ;;  %v1656_v34 = vadd.f32 %v560_v42, %v1502_v17  ;;  %s1726_s1 = sld [smem:[#allocation2 + $0x4e]] }
  0x91   :  { %v613_v39 = vadd.f32 %v611_v18, %v607_v26  ;;  %v614_v40 = vadd.f32 %v612_v9, %v608_v27  ;;  %v634_v8 = vstv %s1614_s30  ;;  %v638_v35 = vstv %s1616_s4  ;;  %s1730_s21 = sld [smem:[#allocation2 + $0x4f]] }
  0x92   :  { %v1665_v11 = vadd.f32 %v591_v5, %v1536_v53  ;;  %v1668_v16 = vadd.f32 %v592_v32, %v1538_v1  ;;  %v635_v17 = vmul.f32 %v634_v8, %v1647_v30  ;;  %v636_v38 = vmul.f32 %v634_v8, %v1650_v31  ;;  %s1736_s22 = sld [smem:[#allocation4 + $0x26]] }
  0x93   :  { %v617_v41 = vadd.f32 %v616_v57, %v613_v39  ;;  %v618_v42 = vadd.f32 %v616_v57, %v614_v40  ;;  %v639_v43 = vmul.f32 %v638_v35, %v1653_v33  ;;  %v640_v44 = vmul.f32 %v638_v35, %v1656_v34  ;;  %s1744_s23 = sld [smem:[#allocation2 + $0x50]] }
  0x94   :  { %v644_v53 = vstv %s1622_s5  ;;  %v650_v45 = vstv %s1626_s2  ;;  %v656_v1 = vstv %s1632_s6  ;;  %v662_v46 = vstv %s1636_s7  ;;  %s1750_s24 = sld [smem:[#allocation2 + $0x51]] }
  0x95   :  { %v619_v47 = vmax.f32 %v617_v41, 0.0  ;;  %v620_v50 = vmax.f32 %v618_v42, 0.0  ;;  %v641_v6 = vadd.f32 %v639_v43, %v635_v17  ;;  %v642_v51 = vadd.f32 %v640_v44, %v636_v38  ;;  %s1754_s25 = sld [smem:[#allocation4 + $0x27]] }
  0x96   :  { %v645_v52 = vmul.f32 %v644_v53, %v1665_v11  ;;  %v646_v54 = vmul.f32 %v644_v53, %v1668_v16  ;;  %v666_v0 = vstv %s1640_s8  ;;  %v670_v55 = vstv %s1644_s9  ;;  %s1760_s26 = sld [smem:[#allocation2 + $0x52]] }
  0x97   :  { %v623_v62 = vadd.f32 %v622_v23, %v619_v47  ;;  %v624_v63 = vadd.f32 %v622_v23, %v620_v50  ;;  %v667_v2 = vmul.f32 %v666_v0, %v1647_v30  ;;  %v668_v3 = vmul.f32 %v666_v0, %v1650_v31  ;;  %s1764_s27 = sld [smem:[#allocation2 + $0x53]] }
  0x98   :  { %v647_v56 = vadd.f32 %v645_v52, %v641_v6  ;;  %v648_v4 = vadd.f32 %v646_v54, %v642_v51  ;;  %v671_v12 = vmul.f32 %v670_v55, %v1653_v33  ;;  %v672_v15 = vmul.f32 %v670_v55, %v1656_v34  ;;  %s1768_s28 = sld [smem:[#allocation2 + $0x54]] }
  0x99   :  { %v1699_v18 = vadd.f32 %v623_v62, %v1568_v36  ;;  %v1702_v9 = vadd.f32 %v624_v63, %v1570_v37  ;;  %v676_v19 = vstv %s1658_s10  ;;  %v682_v22 = vstv %s1662_s11  ;;  %s1771_s29 = sld [smem:[#allocation2 + $0x55]] }
  0x9a   :  { %v673_v57 = vadd.f32 %v671_v12, %v667_v2  ;;  %v674_v23 = vadd.f32 %v672_v15, %v668_v3  ;;  %v677_v26 = vmul.f32 %v676_v19, %v1665_v11  ;;  %v678_v27 = vmul.f32 %v676_v19, %v1668_v16  ;;  %s1785_s30 = sld [smem:[#allocation2 + $0x56]] }
  0x9b   :  { %v651_v36 = vmul.f32 %v650_v45, %v1699_v18  ;;  %v652_v5 = vmul.f32 %v650_v45, %v1702_v9  ;;  %v683_v37 = vmul.f32 %v682_v22, %v1699_v18  ;;  %v684_v32 = vmul.f32 %v682_v22, %v1702_v9  ;;  %s1789_s4 = sld [smem:[#allocation2 + $0x57]] }
  0x9c   :  { %v679_v39 = vadd.f32 %v677_v26, %v673_v57  ;;  %v680_v40 = vadd.f32 %v678_v27, %v674_v23  ;;  %v688_v8 = vstv %s1672_s12  ;;  %v694_v35 = vstv %s1676_s13  ;;  %s1794_s5 = sld [smem:[#allocation4 + $0x28]] }
  0x9d   :  { %v653_v17 = vadd.f32 %v651_v36, %v647_v56  ;;  %v654_v38 = vadd.f32 %v652_v5, %v648_v4  ;;  %v698_v41 = vstv %s1682_s14  ;;  %v702_v42 = vstv %s1684_s15  ;;  %s1798_s2 = sld [smem:[#allocation4 + $0x2a]] }
  0x9e   :  { %v685_v43 = vadd.f32 %v683_v37, %v679_v39  ;;  %v686_v44 = vadd.f32 %v684_v32, %v680_v40  ;;  %v699_v53 = vmul.f32 %v698_v41, %v1647_v30  ;;  %v700_v45 = vmul.f32 %v698_v41, %v1650_v31  ;;  %s1808_s6 = sld [smem:[#allocation2 + $0x58]] }
  0x9f   :  { %v657_v47 = vadd.f32 %v656_v1, %v653_v17  ;;  %v658_v50 = vadd.f32 %v656_v1, %v654_v38  ;;  %v703_v6 = vmul.f32 %v702_v42, %v1653_v33  ;;  %v704_v51 = vmul.f32 %v702_v42, %v1656_v34  ;;  %s1810_s7 = sld [smem:[#allocation2 + $0x59]] }
  0xa0   :  { %v689_v52 = vadd.f32 %v688_v8, %v685_v43  ;;  %v690_v54 = vadd.f32 %v688_v8, %v686_v44  ;;  %v708_v0 = vstv %s1692_s16  ;;  %v714_v55 = vstv %s1696_s17  ;;  %s1814_s8 = sld [smem:[#allocation4 + $0x29]] }
  0xa1   :  { %v659_v62 = vmax.f32 %v657_v47, 0.0  ;;  %v660_v63 = vmax.f32 %v658_v50, 0.0  ;;  %v705_v2 = vadd.f32 %v703_v6, %v699_v53  ;;  %v706_v3 = vadd.f32 %v704_v51, %v700_v45  ;;  %s1820_s9 = sld [smem:[#allocation2 + $0x5a]] }
  0xa2   :  { %v691_v56 = vmax.f32 %v689_v52, 0.0  ;;  %v692_v1 = vmax.f32 %v690_v54, 0.0  ;;  %v709_v4 = vmul.f32 %v708_v0, %v1665_v11  ;;  %v710_v12 = vmul.f32 %v708_v0, %v1668_v16  ;;  %s1824_s10 = sld [smem:[#allocation2 + $0x5b]] }
  0xa3   :  { %v663_v15 = vadd.f32 %v662_v46, %v659_v62  ;;  %v664_v19 = vadd.f32 %v662_v46, %v660_v63  ;;  %v715_v22 = vmul.f32 %v714_v55, %v1699_v18  ;;  %v716_v57 = vmul.f32 %v714_v55, %v1702_v9  ;;  %s1834_s11 = sld [smem:[#allocation4 + $0x2b]] }
  0xa4   :  { %v695_v23 = vadd.f32 %v694_v35, %v691_v56  ;;  %v696_v26 = vadd.f32 %v694_v35, %v692_v1  ;;  %v711_v27 = vadd.f32 %v709_v4, %v705_v2  ;;  %v712_v36 = vadd.f32 %v710_v12, %v706_v3  ;;  %s1838_s12 = sld [smem:[#allocation4 + $0x2c]] }
  0xa5   :  { %v720_v5 = vstv %s1708_s18  ;;  %v726_v37 = vstv %s1714_s19  ;;  %v730_v32 = vstv %s1718_s20  ;;  %v734_v39 = vstv %s1722_s0  ;;  %s1844_s13 = sld [smem:[#allocation4 + $0x2d]] }
  0xa6   :  { %v717_v40 = vadd.f32 %v715_v22, %v711_v27  ;;  %v718_v46 = vadd.f32 %v716_v57, %v712_v36  ;;  %v731_v8 = vmul.f32 %v730_v32, %v1647_v30  ;;  %v732_v17 = vmul.f32 %v730_v32, %v1650_v31  ;;  %s1848_s14 = sld [smem:[#allocation2 + $0x5c]] }
  0xa7   :  { %v735_v35 = vmul.f32 %v734_v39, %v1653_v33  ;;  %v736_v38 = vmul.f32 %v734_v39, %v1656_v34  ;;  %v740_v41 = vstv %s1726_s1  ;;  %v746_v42 = vstv %s1730_s21  ;;  %s1852_s15 = sld [smem:[#allocation2 + $0x5d]] }
  0xa8   :  { %v721_v43 = vadd.f32 %v720_v5, %v717_v40  ;;  %v722_v44 = vadd.f32 %v720_v5, %v718_v46  ;;  %v741_v53 = vmul.f32 %v740_v41, %v1665_v11  ;;  %v742_v45 = vmul.f32 %v740_v41, %v1668_v16  ;;  %s1856_s16 = sld [smem:[#allocation2 + $0x5e]] }
  0xa9   :  { %v737_v30 = vadd.f32 %v735_v35, %v731_v8  ;;  %v738_v31 = vadd.f32 %v736_v38, %v732_v17  ;;  %v747_v47 = vmul.f32 %v746_v42, %v1699_v18  ;;  %v748_v33 = vmul.f32 %v746_v42, %v1702_v9  ;;  %s1860_s17 = sld [smem:[#allocation2 + $0x5f]] }
  0xaa   :  { %v723_v34 = vmax.f32 %v721_v43, 0.0  ;;  %v724_v50 = vmax.f32 %v722_v44, 0.0  ;;  %v752_v6 = vstv %s1736_s22  ;;  %v1774_v51 = vadd.f32 %v663_v15, %v1366_v7  ;;  %s1870_s18 = sld [smem:[#allocation4 + $0x2e]] }
  0xab   :  { %v743_v11 = vadd.f32 %v741_v53, %v737_v30  ;;  %v744_v16 = vadd.f32 %v742_v45, %v738_v31  ;;  %v1777_v52 = vadd.f32 %v664_v19, %v1370_v10  ;;  %v1780_v54 = vadd.f32 %v695_v23, %v1376_v13  ;;  %s1884_s19 = sld [smem:[#allocation4 + $0x2f]] }
  0xac   :  { %v727_v18 = vadd.f32 %v726_v37, %v723_v34  ;;  %v728_v9 = vadd.f32 %v726_v37, %v724_v50  ;;  %v1783_v0 = vadd.f32 %v696_v26, %v1378_v14  ;;  %v770_v63 = vstv %s1744_s23 }
  0xad   :  { %v749_v55 = vadd.f32 %v747_v47, %v743_v11  ;;  %v750_v62 = vadd.f32 %v748_v33, %v744_v16  ;;  %v774_v7 = vstv %s1750_s24  ;;  %v758_v10 = vstv %s1754_s25 }
  0xae   :  { %v771_v2 = vmul.f32 %v770_v63, %v1774_v51  ;;  %v772_v3 = vmul.f32 %v770_v63, %v1777_v52  ;;  %v775_v56 = vmul.f32 %v774_v7, %v1780_v54  ;;  %v776_v1 = vmul.f32 %v774_v7, %v1783_v0 }
  0xaf   :  { %v753_v13 = vadd.f32 %v752_v6, %v749_v55  ;;  %v754_v14 = vadd.f32 %v752_v6, %v750_v62  ;;  %v1801_v4 = vadd.f32 %v727_v18, %v1412_v48  ;;  %v1804_v12 = vadd.f32 %v728_v9, %v1414_v49 }
  0xb0   :  { %v780_v15 = vstv %s1760_s26  ;;  %v786_v19 = vstv %s1764_s27  ;;  %v777_v23 = vadd.f32 %v775_v56, %v771_v2  ;;  %v778_v26 = vadd.f32 %v776_v1, %v772_v3 }
  0xb1   :  { %v755_v22 = vmax.f32 %v753_v13, 0.0  ;;  %v756_v57 = vmax.f32 %v754_v14, 0.0  ;;  %v781_v27 = vmul.f32 %v780_v15, %v1801_v4  ;;  %v782_v36 = vmul.f32 %v780_v15, %v1804_v12 }
  0xb2   :  { %v802_v48 = vstv %s1768_s28  ;;  %v806_v49 = vstv %s1771_s29  ;;  %v812_v41 = vstv %s1785_s30  ;;  %v818_v42 = vstv %s1789_s4 }
  0xb3   :  { %v759_v5 = vadd.f32 %v758_v10, %v755_v22  ;;  %v760_v37 = vadd.f32 %v758_v10, %v756_v57  ;;  %v803_v32 = vmul.f32 %v802_v48, %v1774_v51  ;;  %v804_v39 = vmul.f32 %v802_v48, %v1777_v52 }
  0xb4   :  { %v783_v40 = vadd.f32 %v781_v27, %v777_v23  ;;  %v784_v46 = vadd.f32 %v782_v36, %v778_v26  ;;  %v807_v8 = vmul.f32 %v806_v49, %v1780_v54  ;;  %v808_v17 = vmul.f32 %v806_v49, %v1783_v0 }
  0xb5   :  { %v1827_v35 = vadd.f32 %v759_v5, %v1444_v20  ;;  %v1830_v38 = vadd.f32 %v760_v37, %v1446_v21  ;;  %v813_v53 = vmul.f32 %v812_v41, %v1801_v4  ;;  %v814_v45 = vmul.f32 %v812_v41, %v1804_v12 }
  0xb6   :  { %v809_v43 = vadd.f32 %v807_v8, %v803_v32  ;;  %v810_v44 = vadd.f32 %v808_v17, %v804_v39  ;;  %v792_v47 = vstv %s1794_s5  ;;  %v824_v50 = vstv %s1798_s2 }
  0xb7   :  { %v787_v20 = vmul.f32 %v786_v19, %v1827_v35  ;;  %v788_v21 = vmul.f32 %v786_v19, %v1830_v38  ;;  %v819_v30 = vmul.f32 %v818_v42, %v1827_v35  ;;  %v820_v31 = vmul.f32 %v818_v42, %v1830_v38 }
  0xb8   :  { %v815_v33 = vadd.f32 %v813_v53, %v809_v43  ;;  %v816_v34 = vadd.f32 %v814_v45, %v810_v44  ;;  %v834_v16 = vstv %s1808_s6  ;;  %v838_v18 = vstv %s1810_s7 }
  0xb9   :  { %v789_v6 = vadd.f32 %v787_v20, %v783_v40  ;;  %v790_v11 = vadd.f32 %v788_v21, %v784_v46  ;;  %v835_v62 = vmul.f32 %v834_v16, %v1774_v51  ;;  %v836_v63 = vmul.f32 %v834_v16, %v1777_v52 }
  0xba   :  { %v821_v9 = vadd.f32 %v819_v30, %v815_v33  ;;  %v822_v55 = vadd.f32 %v820_v31, %v816_v34  ;;  %v839_v2 = vmul.f32 %v838_v18, %v1780_v54  ;;  %v840_v3 = vmul.f32 %v838_v18, %v1783_v0 }
  0xbb   :  { %v793_v7 = vadd.f32 %v792_v47, %v789_v6  ;;  %v794_v10 = vadd.f32 %v792_v47, %v790_v11  ;;  %v844_v56 = vstv %s1820_s9  ;;  %v850_v1 = vstv %s1824_s10 }
  0xbc   :  { %v825_v13 = vadd.f32 %v824_v50, %v821_v9  ;;  %v826_v14 = vadd.f32 %v824_v50, %v822_v55  ;;  %v798_v15 = vstv %s1814_s8  ;;  %v830_v19 = vstv %s1834_s11 }
  0xbd   :  { %v841_v22 = vadd.f32 %v839_v2, %v835_v62  ;;  %v842_v57 = vadd.f32 %v840_v3, %v836_v63  ;;  %v845_v27 = vmul.f32 %v844_v56, %v1801_v4  ;;  %v846_v36 = vmul.f32 %v844_v56, %v1804_v12 }
  0xbe   :  { %v827_v23 = vmax.f32 %v825_v13, 0.0  ;;  %v828_v26 = vmax.f32 %v826_v14, 0.0  ;;  %v795_v48 = vmax.f32 %v793_v7, 0.0  ;;  %v796_v49 = vmax.f32 %v794_v10, 0.0 }
  0xbf   :  { %v851_v5 = vmul.f32 %v850_v1, %v1827_v35  ;;  %v852_v37 = vmul.f32 %v850_v1, %v1830_v38  ;;  %v847_v40 = vadd.f32 %v845_v27, %v841_v22  ;;  %v848_v46 = vadd.f32 %v846_v36, %v842_v57 }
  0xc0   :  { %v831_v32 = vadd.f32 %v830_v19, %v827_v23  ;;  %v832_v39 = vadd.f32 %v830_v19, %v828_v26  ;;  %v856_v8 = vstv %s1838_s12  ;;  %v862_v17 = vstv %s1844_s13 }
  0xc1   :  { %v866_v41 = vstv %s1848_s14  ;;  %v870_v42 = vstv %s1852_s15  ;;  %v853_v43 = vadd.f32 %v851_v5, %v847_v40  ;;  %v854_v44 = vadd.f32 %v852_v37, %v848_v46 }
  0xc2   :  { %v867_v53 = vmul.f32 %v866_v41, %v1774_v51  ;;  %v868_v45 = vmul.f32 %v866_v41, %v1777_v52  ;;  %v871_v20 = vmul.f32 %v870_v42, %v1780_v54  ;;  %v872_v21 = vmul.f32 %v870_v42, %v1783_v0 }
  0xc3   :  { %v876_v30 = vstv %s1856_s16  ;;  %v882_v31 = vstv %s1860_s17  ;;  %v857_v47 = vadd.f32 %v856_v8, %v853_v43  ;;  %v858_v33 = vadd.f32 %v856_v8, %v854_v44 }
  0xc4   :  { %v877_v34 = vmul.f32 %v876_v30, %v1801_v4  ;;  %v878_v50 = vmul.f32 %v876_v30, %v1804_v12  ;;  %v873_v6 = vadd.f32 %v871_v20, %v867_v53  ;;  %v874_v11 = vadd.f32 %v872_v21, %v868_v45 }
  0xc5   :  { %v883_v51 = vmul.f32 %v882_v31, %v1827_v35  ;;  %v884_v52 = vmul.f32 %v882_v31, %v1830_v38  ;;  %v799_v54 = vadd.f32 %v798_v15, %v795_v48  ;;  %v800_v16 = vadd.f32 %v798_v15, %v796_v49 }
  0xc6   :  { %v859_v0 = vmax.f32 %v857_v47, 0.0  ;;  %v860_v18 = vmax.f32 %v858_v33, 0.0  ;;  %v879_v9 = vadd.f32 %v877_v34, %v873_v6  ;;  %v880_v55 = vadd.f32 %v878_v50, %v874_v11 }
  0xc7   :  { %v888_v62 = vstv %s1870_s18  ;;  %v899_v12 = vadd.f32 %v831_v32, %v1248_v24  ;;  %v900_v7 = vadd.f32 %v832_v39, %v1250_v25  ;;  %v897_v35 = vadd.f32 %v799_v54, %v1220_v58 }
  0xc8   :  { %v863_v63 = vadd.f32 %v862_v17, %v859_v0  ;;  %v864_v4 = vadd.f32 %v862_v17, %v860_v18  ;;  %v885_v10 = vadd.f32 %v883_v51, %v879_v9  ;;  %v886_v2 = vadd.f32 %v884_v52, %v880_v55 }
  0xc9   :  { %v898_v38 = vadd.f32 %v800_v16, %v1222_v59  ;;  %v907_v1 = vrot.slane %v899_v12, 7  ;;  %v908_v15 = vrot.slane %v900_v7, 7  ;;  %v894_v19 = vstv %s1884_s19 }
  0xca   :  { %v901_v3 = vadd.f32 %v863_v63, %v1286_v60  ;;  %v902_v13 = vadd.f32 %v864_v4, %v1290_v61  ;;  %v889_v14 = vadd.f32 %v888_v62, %v885_v10  ;;  %v890_v56 = vadd.f32 %v888_v62, %v886_v2 }
  0xcb   :  { %v924_v58 = vsel %vm923_vm0, %v897_v35, %v907_v1  ;;  %v925_v27 = vsel %vm923_vm0, %v898_v38, %v908_v15 }
  0xcc   :  { %v891_v22 = vmax.f32 %v889_v14, 0.0  ;;  %v892_v24 = vmax.f32 %v890_v56, 0.0  ;;  %v913_v57 = vrot.slane %v901_v3, 6  ;;  %v914_v25 = vrot.slane %v902_v13, 6 }
  0xce   :  { %v895_v23 = vadd.f32 %v894_v19, %v891_v22  ;;  %v896_v26 = vadd.f32 %v894_v19, %v892_v24  ;;  %v927_v61 = vsel %vm926_vm1, %v924_v58, %v913_v57  ;;  %v928_v36 = vsel %vm926_vm1, %v925_v27, %v914_v25 }
  0xd0   :  { %v903_v59 = vadd.f32 %v895_v23, %v1320_v28  ;;  %v904_v60 = vadd.f32 %v896_v26, %v1322_v29 }
  0xd2   :  { %v919_v48 = vrot.slane %v903_v59, 5  ;;  %v920_v49 = vrot.slane %v904_v60, 5 }
  0xd4   :  { %v930_v5 = vsel %vm929_vm2, %v927_v61, %v919_v48  ;;  %v931_v37 = vsel %vm929_vm2, %v928_v36, %v920_v49 }
  0xd5   :  { %v933_v32 = vsel %vm932_vm3, %v930_v5, %v897_v35  ;;  %v934_v39 = vsel %vm932_vm3, %v931_v37, %v898_v38 }
  0xd6   :  { %v936_v40 = vsel %vm935_vm4, %v933_v32, %v907_v1  ;;  %v937_v46 = vsel %vm935_vm4, %v934_v39, %v908_v15 }
  0xd7   :  { %v939_v8 = vsel %vm938_vm5, %v936_v40, %v913_v57  ;;  %v940_v17 = vsel %vm938_vm5, %v937_v46, %v914_v25 }
  0xd8   :  { %v942_v28 = vsel %vm941_vm6, %v939_v8, %v919_v48  ;;  %v943_v41 = vsel %vm941_vm6, %v940_v17, %v920_v49 }
  0xd9   :  { %944 = vst [vmem:[%s1907_s3] sm:$0xff] %v942_v28  ;;  %945 = vst [vmem:[%s1907_s3 + $0x8] sm:$0xff] %v943_v41 }
  0xda   :  { %950 = vsyncpa [#allocation3], 1 }
  0xdb   :  { %951 = vsyncpa [#allocation5], 1 }

</bundles_post_ra>
